<compile_context>
chip_gen: v6e
topology: v6e:2x2x1
jax: 0.10.0
libtpu: 0.0.40
codegen_flags: <defaults>
</compile_context>

<pallas_src>
import functools

import jax
import jax.numpy as jnp
from jax.experimental import pallas as pl
from jax.experimental.pallas import tpu as pltpu


# ----------------------------------------------------------------------------
# Fused RCAB kernel (one pallas_call for the whole block):
#   conv3d(KxKxK)+bias+ReLU -> conv3d(KxKxK)+bias -> CALayer
#   (global avg-pool -> 1x1x1 conv -> ReLU -> 1x1x1 conv -> sigmoid -> scale)
#   -> + block input
#
# One grid step == one batch sample; all intermediates stay in VMEM/vregs, so
# nothing round-trips HBM between the two convs and the CA layer (previously
# 3 pallas_calls per block).
#
# Each KxKxK conv is evaluated as K*K matmuls of shape
#     (D*H, W*C) @ (W*C, W*Cout)
# using block-banded weights built once in the wrapper (the kw taps and the
# W-direction 'same' zero padding are folded into the weight matrix).  That
# gives contraction depth W*C (=128 here) and a lane-dense W*Cout (=128) wide
# output instead of 27 matmuls with contraction=16 and 16-lane output, and it
# removes all the per-tap slice+reshape materializations of the old kernel.
# D/H 'same' padding is handled with a small VMEM scratch (sublane-dim writes
# only, never lane-offset writes).
# ----------------------------------------------------------------------------
def _rcab_kernel(xpad_ref, w1_ref, b1_ref, w2_ref, b2_ref,
                 caw1_ref, cab1_ref, caw2_ref, cab2_ref,
                 pool_ref, rep_ref,
                 o_ref, hpad_ref, *, K, D, H, W, C):
    pad = K // 2
    WC = W * C
    R = D * H

    def conv_banded(src_ref, lead_idx, wb_ref):
        acc = jnp.zeros((R, WC), jnp.float32)
        for kd in range(K):
            for kh in range(K):
                if lead_idx is None:
                    z = src_ref[kd:kd + D, kh:kh + H, :]
                else:
                    z = src_ref[lead_idx, kd:kd + D, kh:kh + H, :]
                z = z.reshape(R, WC)
                acc = acc + jnp.dot(z, wb_ref[kd, kh, :, :],
                                    preferred_element_type=jnp.float32)
        return acc

    # ---- conv1 + bias + ReLU (on the D/H-padded input block) ---------------
    h1 = jnp.maximum(conv_banded(xpad_ref, 0, w1_ref) + b1_ref[...], 0.0)

    # ---- zero-pad h1 along D/H in VMEM scratch (W padding is in the weights)
    hpad_ref[...] = jnp.zeros_like(hpad_ref)
    hpad_ref[pad:pad + D, pad:pad + H, :] = h1.reshape(D, H, WC)

    # ---- conv2 + bias -------------------------------------------------------
    h2 = conv_banded(hpad_ref, None, w2_ref) + b2_ref[...]          # (R, WC)

    # ---- CALayer: global average pool + squeeze/excite MLP + sigmoid -------
    # row-sum (sublane reduce) then a tiny constant matmul folds W into C,
    # so no lane-unflatten reshape is needed on the big activation.
    pooled = jnp.dot(jnp.sum(h2, axis=0, keepdims=True), pool_ref[...],
                     preferred_element_type=jnp.float32)             # (1, C)
    t = jnp.maximum(jnp.dot(pooled, caw1_ref[...],
                            preferred_element_type=jnp.float32)
                    + cab1_ref[...], 0.0)                            # (1, Cmid)
    s = jax.nn.sigmoid(jnp.dot(t, caw2_ref[...],
                               preferred_element_type=jnp.float32)
                       + cab2_ref[...])                              # (1, C)
    s_full = jnp.dot(s, rep_ref[...],
                     preferred_element_type=jnp.float32)             # (1, WC)

    # ---- channel-attention scale + RCAB residual add ------------------------
    # residual is read straight out of the padded input block that is already
    # in VMEM -> no synthetic zero-residual operand, no extra HBM read.
    x_res = xpad_ref[0, pad:pad + D, pad:pad + H, :].reshape(R, WC)
    o_ref[0, :, :] = (h2 * s_full + x_res).astype(o_ref.dtype)


# ----------------------------------------------------------------------------
# wrapper-side weight preparation + pallas_call
# ----------------------------------------------------------------------------
def _band_conv_weights(wgt, W):
    """(K,K,K,Cin,Cout) conv weights -> (K,K,W*Cin,W*Cout) block-banded
    matrices implementing all kw taps (and the W-direction 'same' padding)
    as one matmul over a (.., W*Cin) lane-flattened input row."""
    K, _, _, Cin, Cout = wgt.shape
    pad = K // 2
    wp = jnp.arange(W)[:, None]              # input position  w'
    wo = jnp.arange(W)[None, :]              # output position w
    kw = wp - wo + pad                       # (W, W) tap index
    valid = (kw >= 0) & (kw < K)
    band = wgt[:, :, jnp.clip(kw, 0, K - 1), :, :]            # (K,K,W,W,Cin,Cout)
    band = band * valid[None, None, :, :, None, None].astype(wgt.dtype)
    band = band.transpose(0, 1, 2, 4, 3, 5)                   # (K,K,W,Cin,W,Cout)
    return band.reshape(K, K, W * Cin, W * Cout)


def rcab_pallas(x_ndhwc, params):
    """Fused RCAB forward.  x: (N, D, H, W, C) float32; returns same shape.
    NOTE: at production D*H*W one would additionally tile D (carrying pooled
    partial sums) to bound VMEM; at these shapes one sample per step fits
    easily and the batch grid axis is marked "parallel" (both v7x TCs).
    A further v6e/v7x option is casting the matmul inputs to bf16 (keep f32
    accumulation); kept f32 here so elementwise math stays native on v5e."""
    N, D, H, W, C = x_ndhwc.shape
    K = params["w1"].shape[0]
    pad = K // 2
    WC = W * C
    Dp, Hp = D + 2 * pad, H + 2 * pad
    cmid = params["ca_w1"].shape[1]

    # D/H 'same' padding here; W padding is folded into the banded weights.
    xpad = jnp.pad(x_ndhwc, ((0, 0), (pad, pad), (pad, pad), (0, 0), (0, 0)))
    xpad = xpad.reshape(N, Dp, Hp, WC)

    w1b = _band_conv_weights(params["w1"], W)
    w2b = _band_conv_weights(params["w2"], W)
    b1t = jnp.tile(params["b1"].reshape(1, C), (1, W))          # (1, WC)
    b2t = jnp.tile(params["b2"].reshape(1, C), (1, W))          # (1, WC)
    eye = jnp.eye(C, dtype=x_ndhwc.dtype)
    pool_mat = jnp.tile(eye, (W, 1)) / float(D * H * W)         # (WC, C)
    rep_mat = jnp.tile(eye, (1, W))                             # (C, WC)

    def full(shape):
        return pl.BlockSpec(shape, lambda n: (0,) * len(shape))

    kernel = functools.partial(_rcab_kernel, K=K, D=D, H=H, W=W, C=C)
    out = pl.pallas_call(
        kernel,
        out_shape=jax.ShapeDtypeStruct((N, D * H, WC), x_ndhwc.dtype),
        grid_spec=pltpu.PrefetchScalarGridSpec(
            num_scalar_prefetch=0,
            grid=(N,),                                  # one sample per step
            in_specs=[
                pl.BlockSpec((1, Dp, Hp, WC), lambda n: (n, 0, 0, 0)),
                full((K, K, WC, WC)), full((1, WC)),
                full((K, K, WC, WC)), full((1, WC)),
                full((C, cmid)), full((1, cmid)),
                full((cmid, C)), full((1, C)),
                full((WC, C)), full((C, WC)),
            ],
            out_specs=pl.BlockSpec((1, D * H, WC), lambda n: (n, 0, 0)),
            scratch_shapes=[pltpu.VMEM((Dp, Hp, WC), jnp.float32)],
        ),
        compiler_params=pltpu.CompilerParams(
            dimension_semantics=("parallel",),
            vmem_limit_bytes=32 * 1024 * 1024),
    )(xpad, w1b, b1t, w2b, b2t,
      params["ca_w1"], params["ca_b1"], params["ca_w2"], params["ca_b2"],
      pool_mat, rep_mat)
    return out.reshape(N, D, H, W, C)


def rcab_forward(x_ncdhw, params):
    """RCAB.forward.  Input/output: NCDHW (PyTorch Conv3d layout)."""
    x = jnp.transpose(x_ncdhw, (0, 2, 3, 4, 1))     # -> NDHWC
    y = rcab_pallas(x, params)
    return jnp.transpose(y, (0, 4, 1, 2, 3))        # -> NCDHW


# ----------------------------------------------------------------------------
# parameters (synthetic Kaiming-like init scaled by 0.1, as tools.initialize_weights)
# Conv weights are stored as (K,K,K,Cin,Cout); real PyTorch Conv3d weights
# (Cout,Cin,K,K,K) would need a transpose to this layout before use.
# ----------------------------------------------------------------------------
def init_rcab_params(key, n_feat, kernel_size, reduction):
    cmid = max(n_feat // reduction, 1)
    fan_conv = n_feat * kernel_size ** 3
    ks = jax.random.split(key, 8)
    shp = (kernel_size,) * 3 + (n_feat, n_feat)
    return dict(
        w1=jax.random.normal(ks[0], shp, jnp.float32) * (0.1 * (2.0 / fan_conv) ** 0.5),
        b1=jax.random.normal(ks[1], (1, n_feat), jnp.float32) * 0.01,
        w2=jax.random.normal(ks[2], shp, jnp.float32) * (0.1 * (1.0 / fan_conv) ** 0.5),
        b2=jax.random.normal(ks[3], (1, n_feat), jnp.float32) * 0.01,
        ca_w1=jax.random.normal(ks[4], (n_feat, cmid), jnp.float32) * (0.1 * (2.0 / n_feat) ** 0.5),
        ca_b1=jax.random.normal(ks[5], (1, cmid), jnp.float32) * 0.01,
        ca_w2=jax.random.normal(ks[6], (cmid, n_feat), jnp.float32) * (0.1 * (1.0 / cmid) ** 0.5),
        ca_b2=jax.random.normal(ks[7], (1, n_feat), jnp.float32) * 0.01,
    )


def rcab_reference(x_ncdhw, params):
    """Pure-JAX reference of RCAB.forward (for validation)."""
    x = jnp.transpose(x_ncdhw, (0, 2, 3, 4, 1))     # NDHWC

    def conv(inp, w, b):
        y = jax.lax.conv_general_dilated(
            inp, w, window_strides=(1, 1, 1), padding="SAME",
            dimension_numbers=("NDHWC", "DHWIO", "NDHWC"),
            precision=jax.lax.Precision.HIGHEST)
        return y + b.reshape(1, 1, 1, 1, -1)

    h = jax.nn.relu(conv(x, params["w1"], params["b1"]))
    h = conv(h, params["w2"], params["b2"])
    pooled = jnp.mean(h, axis=(1, 2, 3))                        # (N, C)
    t = jax.nn.relu(pooled @ params["ca_w1"] + params["ca_b1"])
    s = jax.nn.sigmoid(t @ params["ca_w2"] + params["ca_b2"])
    out = h * s[:, None, None, None, :] + x
    return jnp.transpose(out, (0, 4, 1, 2, 3))


# ----------------------------------------------------------------------------
if __name__ == "__main__":
    n_feat, kernel_size, reduction = 16, 3, 4
    N, D, H, W = 2, 4, 8, 8          # W * n_feat = 128 -> lane-dense layout

    key = jax.random.PRNGKey(0)
    k_x, k_p = jax.random.split(key)

    # PyTorch NCDHW input: (batch, channels, D, H, W)
    x = jax.random.normal(k_x, (N, n_feat, D, H, W), jnp.float32)
    params = init_rcab_params(k_p, n_feat, kernel_size, reduction)

    fwd = jax.jit(lambda xx: rcab_forward(xx, params))
    out = fwd(x)
    jax.block_until_ready(out)

    assert out.shape == x.shape and out.dtype == x.dtype
    ref = rcab_reference(x, params)
    max_err = float(jnp.max(jnp.abs(out - ref)))
    assert max_err < 2e-3, f"mismatch vs pure-JAX reference: {max_err}"
    print("KERNEL_OK")
</pallas_src>

<mosaic_0001>
module attributes {stable_mosaic.version = 11 : i64} {
  func.func @_rcab_kernel(%arg0: i32, %arg1: memref<1x6x10x128xf32, #tpu.memory_space<vmem>>, %arg2: memref<3x3x128x128xf32, #tpu.memory_space<vmem>>, %arg3: memref<1x128xf32, #tpu.memory_space<vmem>>, %arg4: memref<3x3x128x128xf32, #tpu.memory_space<vmem>>, %arg5: memref<1x128xf32, #tpu.memory_space<vmem>>, %arg6: memref<16x4xf32, #tpu.memory_space<vmem>>, %arg7: memref<1x4xf32, #tpu.memory_space<vmem>>, %arg8: memref<4x16xf32, #tpu.memory_space<vmem>>, %arg9: memref<1x16xf32, #tpu.memory_space<vmem>>, %arg10: memref<128x16xf32, #tpu.memory_space<vmem>>, %arg11: memref<16x128xf32, #tpu.memory_space<vmem>>, %arg12: memref<1x32x128xf32, #tpu.memory_space<vmem>>, %arg13: memref<6x10x128xf32, #tpu.memory_space<vmem>>) attributes {dimension_semantics = [#tpu.dimension_semantics<parallel>], iteration_bounds = array<i64: 2>, scalar_prefetch = 0 : i64, scratch_operands = 1 : i64, tpu.core_type = #tpu.core_type<tc>, window_params = [{transform_indices = @transform_0, window_bounds = array<i64: 1, 6, 10, 128>}, {pipeline_mode = #tpu.pipeline_mode<synchronous>, transform_indices = @transform_1, window_bounds = array<i64: 3, 3, 128, 128>}, {pipeline_mode = #tpu.pipeline_mode<synchronous>, transform_indices = @transform_2, window_bounds = array<i64: 1, 128>}, {pipeline_mode = #tpu.pipeline_mode<synchronous>, transform_indices = @transform_3, window_bounds = array<i64: 3, 3, 128, 128>}, {pipeline_mode = #tpu.pipeline_mode<synchronous>, transform_indices = @transform_4, window_bounds = array<i64: 1, 128>}, {pipeline_mode = #tpu.pipeline_mode<synchronous>, transform_indices = @transform_5, window_bounds = array<i64: 16, 4>}, {pipeline_mode = #tpu.pipeline_mode<synchronous>, transform_indices = @transform_6, window_bounds = array<i64: 1, 4>}, {pipeline_mode = #tpu.pipeline_mode<synchronous>, transform_indices = @transform_7, window_bounds = array<i64: 4, 16>}, {pipeline_mode = #tpu.pipeline_mode<synchronous>, transform_indices = @transform_8, window_bounds = array<i64: 1, 16>}, {pipeline_mode = #tpu.pipeline_mode<synchronous>, transform_indices = @transform_9, window_bounds = array<i64: 128, 16>}, {pipeline_mode = #tpu.pipeline_mode<synchronous>, transform_indices = @transform_10, window_bounds = array<i64: 16, 128>}, {transform_indices = @transform_11, window_bounds = array<i64: 1, 32, 128>}]} {
    %cst = arith.constant 0.000000e+00 : f32
    %0 = vector.broadcast %cst : f32 to vector<32x128xf32>
    %c0 = arith.constant 0 : index
    %c0_0 = arith.constant 0 : index
    %c0_1 = arith.constant 0 : index
    %c0_2 = arith.constant 0 : index
    %1 = vector.load %arg1[%c0, %c0_0, %c0_1, %c0_2] : memref<1x6x10x128xf32, #tpu.memory_space<vmem>>, vector<1x4x8x128xf32>
    %2 = vector.shape_cast %1 : vector<1x4x8x128xf32> to vector<4x8x128xf32>
    %3 = vector.shape_cast %2 : vector<4x8x128xf32> to vector<32x128xf32>
    %c0_3 = arith.constant 0 : index
    %c0_4 = arith.constant 0 : index
    %c0_5 = arith.constant 0 : index
    %c0_6 = arith.constant 0 : index
    %4 = vector.load %arg2[%c0_3, %c0_4, %c0_5, %c0_6] : memref<3x3x128x128xf32, #tpu.memory_space<vmem>>, vector<1x1x128x128xf32>
    %5 = vector.shape_cast %4 : vector<1x1x128x128xf32> to vector<128x128xf32>
    %cst_7 = arith.constant dense<0.000000e+00> : vector<32x128xf32>
    %6 = tpu.matmul %3, %5, %cst_7 {dimension_numbers = #tpu.dot_dimension_numbers<[1], [0], [0], [1], [0, 0, 1, 1], [], []>} : vector<32x128xf32>, vector<128x128xf32>, vector<32x128xf32> -> vector<32x128xf32>
    %7 = arith.addf %0, %6 : vector<32x128xf32>
    %c0_8 = arith.constant 0 : index
    %c0_9 = arith.constant 0 : index
    %c1 = arith.constant 1 : index
    %c0_10 = arith.constant 0 : index
    %8 = vector.load %arg1[%c0_8, %c0_9, %c1, %c0_10] : memref<1x6x10x128xf32, #tpu.memory_space<vmem>>, vector<1x4x8x128xf32>
    %9 = vector.shape_cast %8 : vector<1x4x8x128xf32> to vector<4x8x128xf32>
    %10 = vector.shape_cast %9 : vector<4x8x128xf32> to vector<32x128xf32>
    %c0_11 = arith.constant 0 : index
    %c1_12 = arith.constant 1 : index
    %c0_13 = arith.constant 0 : index
    %c0_14 = arith.constant 0 : index
    %11 = vector.load %arg2[%c0_11, %c1_12, %c0_13, %c0_14] : memref<3x3x128x128xf32, #tpu.memory_space<vmem>>, vector<1x1x128x128xf32>
    %12 = vector.shape_cast %11 : vector<1x1x128x128xf32> to vector<128x128xf32>
    %cst_15 = arith.constant dense<0.000000e+00> : vector<32x128xf32>
    %13 = tpu.matmul %10, %12, %cst_15 {dimension_numbers = #tpu.dot_dimension_numbers<[1], [0], [0], [1], [0, 0, 1, 1], [], []>} : vector<32x128xf32>, vector<128x128xf32>, vector<32x128xf32> -> vector<32x128xf32>
    %14 = arith.addf %7, %13 : vector<32x128xf32>
    %c0_16 = arith.constant 0 : index
    %c0_17 = arith.constant 0 : index
    %c2 = arith.constant 2 : index
    %c0_18 = arith.constant 0 : index
    %15 = vector.load %arg1[%c0_16, %c0_17, %c2, %c0_18] : memref<1x6x10x128xf32, #tpu.memory_space<vmem>>, vector<1x4x8x128xf32>
    %16 = vector.shape_cast %15 : vector<1x4x8x128xf32> to vector<4x8x128xf32>
    %17 = vector.shape_cast %16 : vector<4x8x128xf32> to vector<32x128xf32>
    %c0_19 = arith.constant 0 : index
    %c2_20 = arith.constant 2 : index
    %c0_21 = arith.constant 0 : index
    %c0_22 = arith.constant 0 : index
    %18 = vector.load %arg2[%c0_19, %c2_20, %c0_21, %c0_22] : memref<3x3x128x128xf32, #tpu.memory_space<vmem>>, vector<1x1x128x128xf32>
    %19 = vector.shape_cast %18 : vector<1x1x128x128xf32> to vector<128x128xf32>
    %cst_23 = arith.constant dense<0.000000e+00> : vector<32x128xf32>
    %20 = tpu.matmul %17, %19, %cst_23 {dimension_numbers = #tpu.dot_dimension_numbers<[1], [0], [0], [1], [0, 0, 1, 1], [], []>} : vector<32x128xf32>, vector<128x128xf32>, vector<32x128xf32> -> vector<32x128xf32>
    %21 = arith.addf %14, %20 : vector<32x128xf32>
    %c0_24 = arith.constant 0 : index
    %c1_25 = arith.constant 1 : index
    %c0_26 = arith.constant 0 : index
    %c0_27 = arith.constant 0 : index
    %22 = vector.load %arg1[%c0_24, %c1_25, %c0_26, %c0_27] : memref<1x6x10x128xf32, #tpu.memory_space<vmem>>, vector<1x4x8x128xf32>
    %23 = vector.shape_cast %22 : vector<1x4x8x128xf32> to vector<4x8x128xf32>
    %24 = vector.shape_cast %23 : vector<4x8x128xf32> to vector<32x128xf32>
    %c1_28 = arith.constant 1 : index
    %c0_29 = arith.constant 0 : index
    %c0_30 = arith.constant 0 : index
    %c0_31 = arith.constant 0 : index
    %25 = vector.load %arg2[%c1_28, %c0_29, %c0_30, %c0_31] : memref<3x3x128x128xf32, #tpu.memory_space<vmem>>, vector<1x1x128x128xf32>
    %26 = vector.shape_cast %25 : vector<1x1x128x128xf32> to vector<128x128xf32>
    %cst_32 = arith.constant dense<0.000000e+00> : vector<32x128xf32>
    %27 = tpu.matmul %24, %26, %cst_32 {dimension_numbers = #tpu.dot_dimension_numbers<[1], [0], [0], [1], [0, 0, 1, 1], [], []>} : vector<32x128xf32>, vector<128x128xf32>, vector<32x128xf32> -> vector<32x128xf32>
    %28 = arith.addf %21, %27 : vector<32x128xf32>
    %c0_33 = arith.constant 0 : index
    %c1_34 = arith.constant 1 : index
    %c1_35 = arith.constant 1 : index
    %c0_36 = arith.constant 0 : index
    %29 = vector.load %arg1[%c0_33, %c1_34, %c1_35, %c0_36] : memref<1x6x10x128xf32, #tpu.memory_space<vmem>>, vector<1x4x8x128xf32>
    %30 = vector.shape_cast %29 : vector<1x4x8x128xf32> to vector<4x8x128xf32>
    %31 = vector.shape_cast %30 : vector<4x8x128xf32> to vector<32x128xf32>
    %c1_37 = arith.constant 1 : index
    %c1_38 = arith.constant 1 : index
    %c0_39 = arith.constant 0 : index
    %c0_40 = arith.constant 0 : index
    %32 = vector.load %arg2[%c1_37, %c1_38, %c0_39, %c0_40] : memref<3x3x128x128xf32, #tpu.memory_space<vmem>>, vector<1x1x128x128xf32>
    %33 = vector.shape_cast %32 : vector<1x1x128x128xf32> to vector<128x128xf32>
    %cst_41 = arith.constant dense<0.000000e+00> : vector<32x128xf32>
    %34 = tpu.matmul %31, %33, %cst_41 {dimension_numbers = #tpu.dot_dimension_numbers<[1], [0], [0], [1], [0, 0, 1, 1], [], []>} : vector<32x128xf32>, vector<128x128xf32>, vector<32x128xf32> -> vector<32x128xf32>
    %35 = arith.addf %28, %34 : vector<32x128xf32>
    %c0_42 = arith.constant 0 : index
    %c1_43 = arith.constant 1 : index
    %c2_44 = arith.constant 2 : index
    %c0_45 = arith.constant 0 : index
    %36 = vector.load %arg1[%c0_42, %c1_43, %c2_44, %c0_45] : memref<1x6x10x128xf32, #tpu.memory_space<vmem>>, vector<1x4x8x128xf32>
    %37 = vector.shape_cast %36 : vector<1x4x8x128xf32> to vector<4x8x128xf32>
    %38 = vector.shape_cast %37 : vector<4x8x128xf32> to vector<32x128xf32>
    %c1_46 = arith.constant 1 : index
    %c2_47 = arith.constant 2 : index
    %c0_48 = arith.constant 0 : index
    %c0_49 = arith.constant 0 : index
    %39 = vector.load %arg2[%c1_46, %c2_47, %c0_48, %c0_49] : memref<3x3x128x128xf32, #tpu.memory_space<vmem>>, vector<1x1x128x128xf32>
    %40 = vector.shape_cast %39 : vector<1x1x128x128xf32> to vector<128x128xf32>
    %cst_50 = arith.constant dense<0.000000e+00> : vector<32x128xf32>
    %41 = tpu.matmul %38, %40, %cst_50 {dimension_numbers = #tpu.dot_dimension_numbers<[1], [0], [0], [1], [0, 0, 1, 1], [], []>} : vector<32x128xf32>, vector<128x128xf32>, vector<32x128xf32> -> vector<32x128xf32>
    %42 = arith.addf %35, %41 : vector<32x128xf32>
    %c0_51 = arith.constant 0 : index
    %c2_52 = arith.constant 2 : index
    %c0_53 = arith.constant 0 : index
    %c0_54 = arith.constant 0 : index
    %43 = vector.load %arg1[%c0_51, %c2_52, %c0_53, %c0_54] : memref<1x6x10x128xf32, #tpu.memory_space<vmem>>, vector<1x4x8x128xf32>
    %44 = vector.shape_cast %43 : vector<1x4x8x128xf32> to vector<4x8x128xf32>
    %45 = vector.shape_cast %44 : vector<4x8x128xf32> to vector<32x128xf32>
    %c2_55 = arith.constant 2 : index
    %c0_56 = arith.constant 0 : index
    %c0_57 = arith.constant 0 : index
    %c0_58 = arith.constant 0 : index
    %46 = vector.load %arg2[%c2_55, %c0_56, %c0_57, %c0_58] : memref<3x3x128x128xf32, #tpu.memory_space<vmem>>, vector<1x1x128x128xf32>
    %47 = vector.shape_cast %46 : vector<1x1x128x128xf32> to vector<128x128xf32>
    %cst_59 = arith.constant dense<0.000000e+00> : vector<32x128xf32>
    %48 = tpu.matmul %45, %47, %cst_59 {dimension_numbers = #tpu.dot_dimension_numbers<[1], [0], [0], [1], [0, 0, 1, 1], [], []>} : vector<32x128xf32>, vector<128x128xf32>, vector<32x128xf32> -> vector<32x128xf32>
    %49 = arith.addf %42, %48 : vector<32x128xf32>
    %c0_60 = arith.constant 0 : index
    %c2_61 = arith.constant 2 : index
    %c1_62 = arith.constant 1 : index
    %c0_63 = arith.constant 0 : index
    %50 = vector.load %arg1[%c0_60, %c2_61, %c1_62, %c0_63] : memref<1x6x10x128xf32, #tpu.memory_space<vmem>>, vector<1x4x8x128xf32>
    %51 = vector.shape_cast %50 : vector<1x4x8x128xf32> to vector<4x8x128xf32>
    %52 = vector.shape_cast %51 : vector<4x8x128xf32> to vector<32x128xf32>
    %c2_64 = arith.constant 2 : index
    %c1_65 = arith.constant 1 : index
    %c0_66 = arith.constant 0 : index
    %c0_67 = arith.constant 0 : index
    %53 = vector.load %arg2[%c2_64, %c1_65, %c0_66, %c0_67] : memref<3x3x128x128xf32, #tpu.memory_space<vmem>>, vector<1x1x128x128xf32>
    %54 = vector.shape_cast %53 : vector<1x1x128x128xf32> to vector<128x128xf32>
    %cst_68 = arith.constant dense<0.000000e+00> : vector<32x128xf32>
    %55 = tpu.matmul %52, %54, %cst_68 {dimension_numbers = #tpu.dot_dimension_numbers<[1], [0], [0], [1], [0, 0, 1, 1], [], []>} : vector<32x128xf32>, vector<128x128xf32>, vector<32x128xf32> -> vector<32x128xf32>
    %56 = arith.addf %49, %55 : vector<32x128xf32>
    %c0_69 = arith.constant 0 : index
    %c2_70 = arith.constant 2 : index
    %c2_71 = arith.constant 2 : index
    %c0_72 = arith.constant 0 : index
    %57 = vector.load %arg1[%c0_69, %c2_70, %c2_71, %c0_72] : memref<1x6x10x128xf32, #tpu.memory_space<vmem>>, vector<1x4x8x128xf32>
    %58 = vector.shape_cast %57 : vector<1x4x8x128xf32> to vector<4x8x128xf32>
    %59 = vector.shape_cast %58 : vector<4x8x128xf32> to vector<32x128xf32>
    %c2_73 = arith.constant 2 : index
    %c2_74 = arith.constant 2 : index
    %c0_75 = arith.constant 0 : index
    %c0_76 = arith.constant 0 : index
    %60 = vector.load %arg2[%c2_73, %c2_74, %c0_75, %c0_76] : memref<3x3x128x128xf32, #tpu.memory_space<vmem>>, vector<1x1x128x128xf32>
    %61 = vector.shape_cast %60 : vector<1x1x128x128xf32> to vector<128x128xf32>
    %cst_77 = arith.constant dense<0.000000e+00> : vector<32x128xf32>
    %62 = tpu.matmul %59, %61, %cst_77 {dimension_numbers = #tpu.dot_dimension_numbers<[1], [0], [0], [1], [0, 0, 1, 1], [], []>} : vector<32x128xf32>, vector<128x128xf32>, vector<32x128xf32> -> vector<32x128xf32>
    %63 = arith.addf %56, %62 : vector<32x128xf32>
    %c0_78 = arith.constant 0 : index
    %c0_79 = arith.constant 0 : index
    %64 = vector.load %arg3[%c0_78, %c0_79] : memref<1x128xf32, #tpu.memory_space<vmem>>, vector<1x128xf32>
    %65 = vector.broadcast %64 : vector<1x128xf32> to vector<32x128xf32>
    %66 = arith.addf %63, %65 : vector<32x128xf32>
    %cst_80 = arith.constant 0.000000e+00 : f32
    %67 = vector.broadcast %cst_80 : f32 to vector<32x128xf32>
    %68 = arith.maximumf %66, %67 : vector<32x128xf32>
    %cst_81 = arith.constant 0.000000e+00 : f32
    %69 = vector.broadcast %cst_81 : f32 to vector<6x10x128xf32>
    %c0_82 = arith.constant 0 : index
    %c0_83 = arith.constant 0 : index
    %c0_84 = arith.constant 0 : index
    %70 = vector.load %arg13[%c0_82, %c0_83, %c0_84] : memref<6x10x128xf32, #tpu.memory_space<vmem>>, vector<6x10x128xf32>
    tpu.vector_store %arg13[%c0_82, %c0_83, %c0_84], %69 {strides = array<i32>} : memref<6x10x128xf32, #tpu.memory_space<vmem>>, vector<6x10x128xf32>,
    %71 = vector.shape_cast %68 : vector<32x128xf32> to vector<4x8x128xf32>
    %c1_85 = arith.constant 1 : index
    %c1_86 = arith.constant 1 : index
    %c0_87 = arith.constant 0 : index
    %72 = vector.load %arg13[%c1_85, %c1_86, %c0_87] : memref<6x10x128xf32, #tpu.memory_space<vmem>>, vector<4x8x128xf32>
    tpu.vector_store %arg13[%c1_85, %c1_86, %c0_87], %71 {strides = array<i32>} : memref<6x10x128xf32, #tpu.memory_space<vmem>>, vector<4x8x128xf32>,
    %cst_88 = arith.constant 0.000000e+00 : f32
    %73 = vector.broadcast %cst_88 : f32 to vector<32x128xf32>
    %c0_89 = arith.constant 0 : index
    %c0_90 = arith.constant 0 : index
    %c0_91 = arith.constant 0 : index
    %74 = vector.load %arg13[%c0_89, %c0_90, %c0_91] : memref<6x10x128xf32, #tpu.memory_space<vmem>>, vector<4x8x128xf32>
    %75 = vector.shape_cast %74 : vector<4x8x128xf32> to vector<32x128xf32>
    %c0_92 = arith.constant 0 : index
    %c0_93 = arith.constant 0 : index
    %c0_94 = arith.constant 0 : index
    %c0_95 = arith.constant 0 : index
    %76 = vector.load %arg4[%c0_92, %c0_93, %c0_94, %c0_95] : memref<3x3x128x128xf32, #tpu.memory_space<vmem>>, vector<1x1x128x128xf32>
    %77 = vector.shape_cast %76 : vector<1x1x128x128xf32> to vector<128x128xf32>
    %cst_96 = arith.constant dense<0.000000e+00> : vector<32x128xf32>
    %78 = tpu.matmul %75, %77, %cst_96 {dimension_numbers = #tpu.dot_dimension_numbers<[1], [0], [0], [1], [0, 0, 1, 1], [], []>} : vector<32x128xf32>, vector<128x128xf32>, vector<32x128xf32> -> vector<32x128xf32>
    %79 = arith.addf %73, %78 : vector<32x128xf32>
    %c0_97 = arith.constant 0 : index
    %c1_98 = arith.constant 1 : index
    %c0_99 = arith.constant 0 : index
    %80 = vector.load %arg13[%c0_97, %c1_98, %c0_99] : memref<6x10x128xf32, #tpu.memory_space<vmem>>, vector<4x8x128xf32>
    %81 = vector.shape_cast %80 : vector<4x8x128xf32> to vector<32x128xf32>
    %c0_100 = arith.constant 0 : index
    %c1_101 = arith.constant 1 : index
    %c0_102 = arith.constant 0 : index
    %c0_103 = arith.constant 0 : index
    %82 = vector.load %arg4[%c0_100, %c1_101, %c0_102, %c0_103] : memref<3x3x128x128xf32, #tpu.memory_space<vmem>>, vector<1x1x128x128xf32>
    %83 = vector.shape_cast %82 : vector<1x1x128x128xf32> to vector<128x128xf32>
    %cst_104 = arith.constant dense<0.000000e+00> : vector<32x128xf32>
    %84 = tpu.matmul %81, %83, %cst_104 {dimension_numbers = #tpu.dot_dimension_numbers<[1], [0], [0], [1], [0, 0, 1, 1], [], []>} : vector<32x128xf32>, vector<128x128xf32>, vector<32x128xf32> -> vector<32x128xf32>
    %85 = arith.addf %79, %84 : vector<32x128xf32>
    %c0_105 = arith.constant 0 : index
    %c2_106 = arith.constant 2 : index
    %c0_107 = arith.constant 0 : index
    %86 = vector.load %arg13[%c0_105, %c2_106, %c0_107] : memref<6x10x128xf32, #tpu.memory_space<vmem>>, vector<4x8x128xf32>
    %87 = vector.shape_cast %86 : vector<4x8x128xf32> to vector<32x128xf32>
    %c0_108 = arith.constant 0 : index
    %c2_109 = arith.constant 2 : index
    %c0_110 = arith.constant 0 : index
    %c0_111 = arith.constant 0 : index
    %88 = vector.load %arg4[%c0_108, %c2_109, %c0_110, %c0_111] : memref<3x3x128x128xf32, #tpu.memory_space<vmem>>, vector<1x1x128x128xf32>
    %89 = vector.shape_cast %88 : vector<1x1x128x128xf32> to vector<128x128xf32>
    %cst_112 = arith.constant dense<0.000000e+00> : vector<32x128xf32>
    %90 = tpu.matmul %87, %89, %cst_112 {dimension_numbers = #tpu.dot_dimension_numbers<[1], [0], [0], [1], [0, 0, 1, 1], [], []>} : vector<32x128xf32>, vector<128x128xf32>, vector<32x128xf32> -> vector<32x128xf32>
    %91 = arith.addf %85, %90 : vector<32x128xf32>
    %c1_113 = arith.constant 1 : index
    %c0_114 = arith.constant 0 : index
    %c0_115 = arith.constant 0 : index
    %92 = vector.load %arg13[%c1_113, %c0_114, %c0_115] : memref<6x10x128xf32, #tpu.memory_space<vmem>>, vector<4x8x128xf32>
    %93 = vector.shape_cast %92 : vector<4x8x128xf32> to vector<32x128xf32>
    %c1_116 = arith.constant 1 : index
    %c0_117 = arith.constant 0 : index
    %c0_118 = arith.constant 0 : index
    %c0_119 = arith.constant 0 : index
    %94 = vector.load %arg4[%c1_116, %c0_117, %c0_118, %c0_119] : memref<3x3x128x128xf32, #tpu.memory_space<vmem>>, vector<1x1x128x128xf32>
    %95 = vector.shape_cast %94 : vector<1x1x128x128xf32> to vector<128x128xf32>
    %cst_120 = arith.constant dense<0.000000e+00> : vector<32x128xf32>
    %96 = tpu.matmul %93, %95, %cst_120 {dimension_numbers = #tpu.dot_dimension_numbers<[1], [0], [0], [1], [0, 0, 1, 1], [], []>} : vector<32x128xf32>, vector<128x128xf32>, vector<32x128xf32> -> vector<32x128xf32>
    %97 = arith.addf %91, %96 : vector<32x128xf32>
    %c1_121 = arith.constant 1 : index
    %c1_122 = arith.constant 1 : index
    %c0_123 = arith.constant 0 : index
    %98 = vector.load %arg13[%c1_121, %c1_122, %c0_123] : memref<6x10x128xf32, #tpu.memory_space<vmem>>, vector<4x8x128xf32>
    %99 = vector.shape_cast %98 : vector<4x8x128xf32> to vector<32x128xf32>
    %c1_124 = arith.constant 1 : index
    %c1_125 = arith.constant 1 : index
    %c0_126 = arith.constant 0 : index
    %c0_127 = arith.constant 0 : index
    %100 = vector.load %arg4[%c1_124, %c1_125, %c0_126, %c0_127] : memref<3x3x128x128xf32, #tpu.memory_space<vmem>>, vector<1x1x128x128xf32>
    %101 = vector.shape_cast %100 : vector<1x1x128x128xf32> to vector<128x128xf32>
    %cst_128 = arith.constant dense<0.000000e+00> : vector<32x128xf32>
    %102 = tpu.matmul %99, %101, %cst_128 {dimension_numbers = #tpu.dot_dimension_numbers<[1], [0], [0], [1], [0, 0, 1, 1], [], []>} : vector<32x128xf32>, vector<128x128xf32>, vector<32x128xf32> -> vector<32x128xf32>
    %103 = arith.addf %97, %102 : vector<32x128xf32>
    %c1_129 = arith.constant 1 : index
    %c2_130 = arith.constant 2 : index
    %c0_131 = arith.constant 0 : index
    %104 = vector.load %arg13[%c1_129, %c2_130, %c0_131] : memref<6x10x128xf32, #tpu.memory_space<vmem>>, vector<4x8x128xf32>
    %105 = vector.shape_cast %104 : vector<4x8x128xf32> to vector<32x128xf32>
    %c1_132 = arith.constant 1 : index
    %c2_133 = arith.constant 2 : index
    %c0_134 = arith.constant 0 : index
    %c0_135 = arith.constant 0 : index
    %106 = vector.load %arg4[%c1_132, %c2_133, %c0_134, %c0_135] : memref<3x3x128x128xf32, #tpu.memory_space<vmem>>, vector<1x1x128x128xf32>
    %107 = vector.shape_cast %106 : vector<1x1x128x128xf32> to vector<128x128xf32>
    %cst_136 = arith.constant dense<0.000000e+00> : vector<32x128xf32>
    %108 = tpu.matmul %105, %107, %cst_136 {dimension_numbers = #tpu.dot_dimension_numbers<[1], [0], [0], [1], [0, 0, 1, 1], [], []>} : vector<32x128xf32>, vector<128x128xf32>, vector<32x128xf32> -> vector<32x128xf32>
    %109 = arith.addf %103, %108 : vector<32x128xf32>
    %c2_137 = arith.constant 2 : index
    %c0_138 = arith.constant 0 : index
    %c0_139 = arith.constant 0 : index
    %110 = vector.load %arg13[%c2_137, %c0_138, %c0_139] : memref<6x10x128xf32, #tpu.memory_space<vmem>>, vector<4x8x128xf32>
    %111 = vector.shape_cast %110 : vector<4x8x128xf32> to vector<32x128xf32>
    %c2_140 = arith.constant 2 : index
    %c0_141 = arith.constant 0 : index
    %c0_142 = arith.constant 0 : index
    %c0_143 = arith.constant 0 : index
    %112 = vector.load %arg4[%c2_140, %c0_141, %c0_142, %c0_143] : memref<3x3x128x128xf32, #tpu.memory_space<vmem>>, vector<1x1x128x128xf32>
    %113 = vector.shape_cast %112 : vector<1x1x128x128xf32> to vector<128x128xf32>
    %cst_144 = arith.constant dense<0.000000e+00> : vector<32x128xf32>
    %114 = tpu.matmul %111, %113, %cst_144 {dimension_numbers = #tpu.dot_dimension_numbers<[1], [0], [0], [1], [0, 0, 1, 1], [], []>} : vector<32x128xf32>, vector<128x128xf32>, vector<32x128xf32> -> vector<32x128xf32>
    %115 = arith.addf %109, %114 : vector<32x128xf32>
    %c2_145 = arith.constant 2 : index
    %c1_146 = arith.constant 1 : index
    %c0_147 = arith.constant 0 : index
    %116 = vector.load %arg13[%c2_145, %c1_146, %c0_147] : memref<6x10x128xf32, #tpu.memory_space<vmem>>, vector<4x8x128xf32>
    %117 = vector.shape_cast %116 : vector<4x8x128xf32> to vector<32x128xf32>
    %c2_148 = arith.constant 2 : index
    %c1_149 = arith.constant 1 : index
    %c0_150 = arith.constant 0 : index
    %c0_151 = arith.constant 0 : index
    %118 = vector.load %arg4[%c2_148, %c1_149, %c0_150, %c0_151] : memref<3x3x128x128xf32, #tpu.memory_space<vmem>>, vector<1x1x128x128xf32>
    %119 = vector.shape_cast %118 : vector<1x1x128x128xf32> to vector<128x128xf32>
    %cst_152 = arith.constant dense<0.000000e+00> : vector<32x128xf32>
    %120 = tpu.matmul %117, %119, %cst_152 {dimension_numbers = #tpu.dot_dimension_numbers<[1], [0], [0], [1], [0, 0, 1, 1], [], []>} : vector<32x128xf32>, vector<128x128xf32>, vector<32x128xf32> -> vector<32x128xf32>
    %121 = arith.addf %115, %120 : vector<32x128xf32>
    %c2_153 = arith.constant 2 : index
    %c2_154 = arith.constant 2 : index
    %c0_155 = arith.constant 0 : index
    %122 = vector.load %arg13[%c2_153, %c2_154, %c0_155] : memref<6x10x128xf32, #tpu.memory_space<vmem>>, vector<4x8x128xf32>
    %123 = vector.shape_cast %122 : vector<4x8x128xf32> to vector<32x128xf32>
    %c2_156 = arith.constant 2 : index
    %c2_157 = arith.constant 2 : index
    %c0_158 = arith.constant 0 : index
    %c0_159 = arith.constant 0 : index
    %124 = vector.load %arg4[%c2_156, %c2_157, %c0_158, %c0_159] : memref<3x3x128x128xf32, #tpu.memory_space<vmem>>, vector<1x1x128x128xf32>
    %125 = vector.shape_cast %124 : vector<1x1x128x128xf32> to vector<128x128xf32>
    %cst_160 = arith.constant dense<0.000000e+00> : vector<32x128xf32>
    %126 = tpu.matmul %123, %125, %cst_160 {dimension_numbers = #tpu.dot_dimension_numbers<[1], [0], [0], [1], [0, 0, 1, 1], [], []>} : vector<32x128xf32>, vector<128x128xf32>, vector<32x128xf32> -> vector<32x128xf32>
    %127 = arith.addf %121, %126 : vector<32x128xf32>
    %c0_161 = arith.constant 0 : index
    %c0_162 = arith.constant 0 : index
    %128 = vector.load %arg5[%c0_161, %c0_162] : memref<1x128xf32, #tpu.memory_space<vmem>>, vector<1x128xf32>
    %129 = vector.broadcast %128 : vector<1x128xf32> to vector<32x128xf32>
    %130 = arith.addf %127, %129 : vector<32x128xf32>
    %cst_163 = arith.constant dense<0.000000e+00> : vector<128xf32>
    %131 = vector.multi_reduction <add>, %130, %cst_163 [0] : vector<32x128xf32> to vector<128xf32>
    %132 = vector.shape_cast %131 : vector<128xf32> to vector<1x128xf32>
    %c0_164 = arith.constant 0 : index
    %c0_165 = arith.constant 0 : index
    %133 = vector.load %arg10[%c0_164, %c0_165] : memref<128x16xf32, #tpu.memory_space<vmem>>, vector<128x16xf32>
    %cst_166 = arith.constant dense<0.000000e+00> : vector<1x16xf32>
    %134 = tpu.matmul %132, %133, %cst_166 {dimension_numbers = #tpu.dot_dimension_numbers<[1], [0], [0], [1], [0, 0, 1, 1], [], []>} : vector<1x128xf32>, vector<128x16xf32>, vector<1x16xf32> -> vector<1x16xf32>
    %c0_167 = arith.constant 0 : index
    %c0_168 = arith.constant 0 : index
    %135 = vector.load %arg6[%c0_167, %c0_168] : memref<16x4xf32, #tpu.memory_space<vmem>>, vector<16x4xf32>
    %cst_169 = arith.constant dense<0.000000e+00> : vector<1x4xf32>
    %136 = tpu.matmul %134, %135, %cst_169 {dimension_numbers = #tpu.dot_dimension_numbers<[1], [0], [0], [1], [0, 0, 1, 1], [], []>} : vector<1x16xf32>, vector<16x4xf32>, vector<1x4xf32> -> vector<1x4xf32>
    %c0_170 = arith.constant 0 : index
    %c0_171 = arith.constant 0 : index
    %137 = vector.load %arg7[%c0_170, %c0_171] : memref<1x4xf32, #tpu.memory_space<vmem>>, vector<1x4xf32>
    %138 = arith.addf %136, %137 : vector<1x4xf32>
    %cst_172 = arith.constant 0.000000e+00 : f32
    %139 = vector.broadcast %cst_172 : f32 to vector<1x4xf32>
    %140 = arith.maximumf %138, %139 : vector<1x4xf32>
    %c0_173 = arith.constant 0 : index
    %c0_174 = arith.constant 0 : index
    %141 = vector.load %arg8[%c0_173, %c0_174] : memref<4x16xf32, #tpu.memory_space<vmem>>, vector<4x16xf32>
    %cst_175 = arith.constant dense<0.000000e+00> : vector<1x16xf32>
    %142 = tpu.matmul %140, %141, %cst_175 {dimension_numbers = #tpu.dot_dimension_numbers<[1], [0], [0], [1], [0, 0, 1, 1], [], []>} : vector<1x4xf32>, vector<4x16xf32>, vector<1x16xf32> -> vector<1x16xf32>
    %c0_176 = arith.constant 0 : index
    %c0_177 = arith.constant 0 : index
    %143 = vector.load %arg9[%c0_176, %c0_177] : memref<1x16xf32, #tpu.memory_space<vmem>>, vector<1x16xf32>
    %144 = arith.addf %142, %143 : vector<1x16xf32>
    %145 = arith.negf %144 : vector<1x16xf32>
    %146 = math.exp %145 : vector<1x16xf32>
    %cst_178 = arith.constant 1.000000e+00 : f32
    %147 = vector.broadcast %cst_178 : f32 to vector<1x16xf32>
    %148 = arith.addf %147, %146 : vector<1x16xf32>
    %149 = arith.divf %147, %148 : vector<1x16xf32>
    %c0_179 = arith.constant 0 : index
    %c0_180 = arith.constant 0 : index
    %150 = vector.load %arg11[%c0_179, %c0_180] : memref<16x128xf32, #tpu.memory_space<vmem>>, vector<16x128xf32>
    %cst_181 = arith.constant dense<0.000000e+00> : vector<1x128xf32>
    %151 = tpu.matmul %149, %150, %cst_181 {dimension_numbers = #tpu.dot_dimension_numbers<[1], [0], [0], [1], [0, 0, 1, 1], [], []>} : vector<1x16xf32>, vector<16x128xf32>, vector<1x128xf32> -> vector<1x128xf32>
    %c0_182 = arith.constant 0 : index
    %c1_183 = arith.constant 1 : index
    %c1_184 = arith.constant 1 : index
    %c0_185 = arith.constant 0 : index
    %152 = vector.load %arg1[%c0_182, %c1_183, %c1_184, %c0_185] : memref<1x6x10x128xf32, #tpu.memory_space<vmem>>, vector<1x4x8x128xf32>
    %153 = vector.shape_cast %152 : vector<1x4x8x128xf32> to vector<4x8x128xf32>
    %154 = vector.shape_cast %153 : vector<4x8x128xf32> to vector<32x128xf32>
    %155 = vector.broadcast %151 : vector<1x128xf32> to vector<32x128xf32>
    %156 = arith.mulf %130, %155 : vector<32x128xf32>
    %157 = arith.addf %156, %154 : vector<32x128xf32>
    %c0_186 = arith.constant 0 : index
    %c0_187 = arith.constant 0 : index
    %c0_188 = arith.constant 0 : index
    %158 = vector.load %arg12[%c0_186, %c0_187, %c0_188] : memref<1x32x128xf32, #tpu.memory_space<vmem>>, vector<1x32x128xf32>
    %159 = vector.shape_cast %158 : vector<1x32x128xf32> to vector<32x128xf32>
    %160 = vector.shape_cast %157 : vector<32x128xf32> to vector<1x32x128xf32>
    tpu.vector_store %arg12[%c0_186, %c0_187, %c0_188], %160 {strides = array<i32>} : memref<1x32x128xf32, #tpu.memory_space<vmem>>, vector<1x32x128xf32>,
    return
  }
  func.func @transform_0(%arg0: i32) -> (i32, i32, i32, i32) {
    %c0_i32 = arith.constant 0 : i32
    %c0_i32_0 = arith.constant 0 : i32
    %c0_i32_1 = arith.constant 0 : i32
    %c0_i32_2 = arith.constant 0 : i32
    return %arg0, %c0_i32, %c0_i32_0, %c0_i32_1 : i32, i32, i32, i32
  }
  func.func @transform_1(%arg0: i32) -> (i32, i32, i32, i32) {
    %c0_i32 = arith.constant 0 : i32
    %c0_i32_0 = arith.constant 0 : i32
    %c0_i32_1 = arith.constant 0 : i32
    %c0_i32_2 = arith.constant 0 : i32
    %c0_i32_3 = arith.constant 0 : i32
    return %c0_i32, %c0_i32_0, %c0_i32_1, %c0_i32_2 : i32, i32, i32, i32
  }
  func.func @transform_2(%arg0: i32) -> (i32, i32) {
    %c0_i32 = arith.constant 0 : i32
    %c0_i32_0 = arith.constant 0 : i32
    %c0_i32_1 = arith.constant 0 : i32
    return %c0_i32, %c0_i32_0 : i32, i32
  }
  func.func @transform_3(%arg0: i32) -> (i32, i32, i32, i32) {
    %c0_i32 = arith.constant 0 : i32
    %c0_i32_0 = arith.constant 0 : i32
    %c0_i32_1 = arith.constant 0 : i32
    %c0_i32_2 = arith.constant 0 : i32
    %c0_i32_3 = arith.constant 0 : i32
    return %c0_i32, %c0_i32_0, %c0_i32_1, %c0_i32_2 : i32, i32, i32, i32
  }
  func.func @transform_4(%arg0: i32) -> (i32, i32) {
    %c0_i32 = arith.constant 0 : i32
    %c0_i32_0 = arith.constant 0 : i32
    %c0_i32_1 = arith.constant 0 : i32
    return %c0_i32, %c0_i32_0 : i32, i32
  }
  func.func @transform_5(%arg0: i32) -> (i32, i32) {
    %c0_i32 = arith.constant 0 : i32
    %c0_i32_0 = arith.constant 0 : i32
    %c0_i32_1 = arith.constant 0 : i32
    return %c0_i32, %c0_i32_0 : i32, i32
  }
  func.func @transform_6(%arg0: i32) -> (i32, i32) {
    %c0_i32 = arith.constant 0 : i32
    %c0_i32_0 = arith.constant 0 : i32
    %c0_i32_1 = arith.constant 0 : i32
    return %c0_i32, %c0_i32_0 : i32, i32
  }
  func.func @transform_7(%arg0: i32) -> (i32, i32) {
    %c0_i32 = arith.constant 0 : i32
    %c0_i32_0 = arith.constant 0 : i32
    %c0_i32_1 = arith.constant 0 : i32
    return %c0_i32, %c0_i32_0 : i32, i32
  }
  func.func @transform_8(%arg0: i32) -> (i32, i32) {
    %c0_i32 = arith.constant 0 : i32
    %c0_i32_0 = arith.constant 0 : i32
    %c0_i32_1 = arith.constant 0 : i32
    return %c0_i32, %c0_i32_0 : i32, i32
  }
  func.func @transform_9(%arg0: i32) -> (i32, i32) {
    %c0_i32 = arith.constant 0 : i32
    %c0_i32_0 = arith.constant 0 : i32
    %c0_i32_1 = arith.constant 0 : i32
    return %c0_i32, %c0_i32_0 : i32, i32
  }
  func.func @transform_10(%arg0: i32) -> (i32, i32) {
    %c0_i32 = arith.constant 0 : i32
    %c0_i32_0 = arith.constant 0 : i32
    %c0_i32_1 = arith.constant 0 : i32
    return %c0_i32, %c0_i32_0 : i32, i32
  }
  func.func @transform_11(%arg0: i32) -> (i32, i32, i32) {
    %c0_i32 = arith.constant 0 : i32
    %c0_i32_0 = arith.constant 0 : i32
    %c0_i32_1 = arith.constant 0 : i32
    return %arg0, %c0_i32, %c0_i32_0 : i32, i32, i32
  }
}

</mosaic_0001>

<bundles_post_ra>
// kernel: tile.35
= control target key start
LH: loop header
LB: loop body
LE: loop exit
PB: predicated region body
PF: predicated region fallthrough
CT: control target
= control target key end

     0   :  { %vm4_vm0 = vcmask 1047556   ;;  %s209_s14 = smov 96   ;;  %s210_s19 = smov 112   ;;  %vm6_vm1 = vcmask 130048   ;;  %vm25_vm2 = vcmask 1048448   ;;  %vm46_vm3 = vcmask 917248   ;;  %s388_s0 = inlined_call_operand.vmem [shape: f32[16,8,16], index: 0, kind: input, shape index: {}]   ;;  %s389_s1 = inlined_call_operand.vmem [shape: f32[16,128], index: 1, kind: output, shape index: {}]  }
   0x1   :  { %v172_v0 = vld [vmem:[%s388_s0 + $0x6] ss:$8 sm:$0xf]   ;;  %v167_v3 = vld [vmem:[%s388_s0 + $0x7] ss:$8 sm:$0xf]  }
   0x2   :  { %v173_v1 = vld [vmem:[%s388_s0 + $0x6] ss:$8 sm:$0xf0]   ;;  %v168_v4 = vld [vmem:[%s388_s0 + $0x7] ss:$8 sm:$0xf0]  }
   0x3   :  { %v43_v2 = vsel %vm4_vm0, %v173_v1, %v172_v0  ;;  %v22_v5 = vsel %vm4_vm0, %v168_v4, %v167_v3  ;;  %v174_v6 = vld [vmem:[%s388_s0 + $0x46] ss:$8 sm:$0xf]   ;;  %v169_v9 = vld [vmem:[%s388_s0 + $0x47] ss:$8 sm:$0xf]  }
   0x4   :  { %44 = vrot.lane.b32.xlu1 %v43_v2, %s209_s14  ;;  %v175_v7 = vld [vmem:[%s388_s0 + $0x46] ss:$8 sm:$0xf0]   ;;  %23 = vrot.lane.b32.xlu0 %v22_v5, %s210_s19  ;;  %v170_v10 = vld [vmem:[%s388_s0 + $0x47] ss:$8 sm:$0xf0]  }
   0x5   :  { %v53_v8 = vsel %vm4_vm0, %v175_v7, %v174_v6  ;;  %v32_v11 = vsel %vm4_vm0, %v170_v10, %v169_v9  ;;  %v179_v12 = vld [vmem:[%s388_s0 + $0x45] ss:$8 sm:$0xf]   ;;  %v184_v18 = vld [vmem:[%s388_s0 + $0x44] ss:$8 sm:$0xf]  }
   0x6   :  { %v180_v13 = vld [vmem:[%s388_s0 + $0x45] ss:$8 sm:$0xf0]   ;;  %v185_v19 = vld [vmem:[%s388_s0 + $0x44] ss:$8 sm:$0xf0]  }
   0x7   :  { %v177_v14 = vld [vmem:[%s388_s0 + $0x5] ss:$8 sm:$0xf]   ;;  %v74_v16 = vsel %vm4_vm0, %v180_v13, %v179_v12  ;;  %v182_v20 = vld [vmem:[%s388_s0 + $0x4] ss:$8 sm:$0xf]   ;;  %v95_v22 = vsel %vm4_vm0, %v185_v19, %v184_v18 }
   0x8   :  { %54 = vrot.lane.b32.xlu1 %v53_v8, %s209_s14  ;;  %v178_v15 = vld [vmem:[%s388_s0 + $0x5] ss:$8 sm:$0xf0]   ;;  %33 = vrot.lane.b32.xlu0 %v32_v11, %s210_s19  ;;  %v183_v21 = vld [vmem:[%s388_s0 + $0x4] ss:$8 sm:$0xf0]  }
   0x9   :  { %v64_v17 = vsel %vm4_vm0, %v178_v15, %v177_v14  ;;  %s211_s11 = smov 80   ;;  %v85_v23 = vsel %vm4_vm0, %v183_v21, %v182_v20  ;;  %v189_v24 = vld [vmem:[%s388_s0 + $0x43] ss:$8 sm:$0xf]   ;;  %s212_s20 = smov 64   ;;  %vm67_vm4 = vcmask 786048  }
   0xa   :  { %v190_v25 = vld [vmem:[%s388_s0 + $0x43] ss:$8 sm:$0xf0]   ;;  %v194_v28 = vld [vmem:[%s388_s0 + $0x42] ss:$8 sm:$0xf]  }
   0xb   :  { %v187_v26 = vld [vmem:[%s388_s0 + $0x3] ss:$8 sm:$0xf]   ;;  %v195_v29 = vld [vmem:[%s388_s0 + $0x42] ss:$8 sm:$0xf0]   ;;  %v116_v30 = vsel %vm4_vm0, %v190_v25, %v189_v24 }
   0xc   :  { %75 = vrot.lane.b32.xlu1 %v74_v16, %s211_s11  ;;  %65 = vrot.lane.b32.xlu0 %v64_v17, %s211_s11  ;;  %v188_v27 = vld [vmem:[%s388_s0 + $0x3] ss:$8 sm:$0xf0]   ;;  %v192_v31 = vld [vmem:[%s388_s0 + $0x2] ss:$8 sm:$0xf]   ;;  %v137_v40 = vsel %vm4_vm0, %v195_v29, %v194_v28 }
   0xd   :  { %v2_v32 = vld [vmem:[%s388_s0] ss:$8 sm:$0xf]   ;;  %v106_v33 = vsel %vm4_vm0, %v188_v27, %v187_v26  ;;  %v193_v36 = vld [vmem:[%s388_s0 + $0x2] ss:$8 sm:$0xf0]  }
   0xe   :  { %v3_v34 = vld [vmem:[%s388_s0] ss:$8 sm:$0xf0]   ;;  %s213_s8 = smov 48   ;;  %v127_v41 = vsel %vm4_vm0, %v193_v36, %v192_v31  ;;  %s215_s21 = smov 16   ;;  %vm88_vm5 = vcmask 654848  }
   0xf   :  { %v164_v35 = vld [vmem:[%s388_s0 + $0x40] ss:$8 sm:$0xf]   ;;  %v5_v37 = vsel %vm4_vm0, %v3_v34, %v2_v32  ;;  %v199_v42 = vld [vmem:[%s388_s0 + $0x41] ss:$8 sm:$0xf]  }
  0x10   :  { %96 = vrot.lane.b32.xlu1 %v95_v22, %s212_s20  ;;  %86 = vrot.lane.b32.xlu0 %v85_v23, %s212_s20  ;;  %v165_v38 = vld [vmem:[%s388_s0 + $0x40] ss:$8 sm:$0xf0]   ;;  %7 = vst.msk [vmem:[%s389_s1] sm:$0xff] %vm6_vm1, %v5_v37   ;;  %vm109_vm6 = vcmask 523648   ;;  %vm130_vm7 = vcmask 392448  }
  0x11   :  { %v13_v39 = vsel %vm4_vm0, %v165_v38, %v164_v35  ;;  %v200_v43 = vld [vmem:[%s388_s0 + $0x41] ss:$8 sm:$0xf0]   ;;  %vm151_vm8 = vcmask 261248  }
  0x12   :  { %166 = vst.msk [vmem:[%s389_s1 + $0x8] sm:$0xff] %vm6_vm1, %v13_v39   ;;  %v197_v44 = vld [vmem:[%s388_s0 + $0x1] ss:$8 sm:$0xf]   ;;  %v158_v46 = vsel %vm4_vm0, %v200_v43, %v199_v42 }
  0x13   :  { %v198_v45 = vld [vmem:[%s388_s0 + $0x1] ss:$8 sm:$0xf0]   ;;  %s214_s0 = smov 32  }
  0x14   :  { %117 = vrot.lane.b32.xlu1 %v116_v30, %s213_s8  ;;  %107 = vrot.lane.b32.xlu0 %v106_v33, %s213_s8  ;;  %v148_v47 = vsel %vm4_vm0, %v198_v45, %v197_v44 }
  0x18   :  { %138 = vrot.lane.b32.xlu1 %v137_v40, %s214_s0  ;;  %128 = vrot.lane.b32.xlu0 %v127_v41, %s214_s0 }
  0x1c   :  { %159 = vrot.lane.b32.xlu1 %v158_v46, %s215_s21  ;;  %149 = vrot.lane.b32.xlu0 %v148_v47, %s215_s21 }
  0x76   :  { %v45_v48 = vpop.permute.xlu1 %44   ;;  %v24_v49 = vpop.permute.xlu0 %23  }
  0x77   :  { %26 = vst.msk [vmem:[%s389_s1] sm:$0xff] %vm25_vm2, %v24_v49  }
  0x78   :  { %47 = vst.msk [vmem:[%s389_s1] sm:$0xff] %vm46_vm3, %v45_v48  }
  0x7a   :  { %v55_v50 = vpop.permute.xlu1 %54   ;;  %v34_v51 = vpop.permute.xlu0 %33  }
  0x7b   :  { %171 = vst.msk [vmem:[%s389_s1 + $0x8] sm:$0xff] %vm25_vm2, %v34_v51  }
  0x7c   :  { %176 = vst.msk [vmem:[%s389_s1 + $0x8] sm:$0xff] %vm46_vm3, %v55_v50  }
  0x7e   :  { %v76_v52 = vpop.permute.xlu1 %75   ;;  %v66_v53 = vpop.permute.xlu0 %65  }
  0x7f   :  { %181 = vst.msk [vmem:[%s389_s1 + $0x8] sm:$0xff] %vm67_vm4, %v76_v52   ;;  %68 = vst.msk [vmem:[%s389_s1] sm:$0xff] %vm67_vm4, %v66_v53  }
  0x82   :  { %v97_v54 = vpop.permute.xlu1 %96   ;;  %v87_v55 = vpop.permute.xlu0 %86  }
  0x83   :  { %186 = vst.msk [vmem:[%s389_s1 + $0x8] sm:$0xff] %vm88_vm5, %v97_v54   ;;  %89 = vst.msk [vmem:[%s389_s1] sm:$0xff] %vm88_vm5, %v87_v55  }
  0x86   :  { %v118_v56 = vpop.permute.xlu1 %117   ;;  %v108_v57 = vpop.permute.xlu0 %107  }
  0x87   :  { %191 = vst.msk [vmem:[%s389_s1 + $0x8] sm:$0xff] %vm109_vm6, %v118_v56   ;;  %110 = vst.msk [vmem:[%s389_s1] sm:$0xff] %vm109_vm6, %v108_v57  }
  0x8a   :  { %v139_v58 = vpop.permute.xlu1 %138   ;;  %v129_v59 = vpop.permute.xlu0 %128  }
  0x8b   :  { %196 = vst.msk [vmem:[%s389_s1 + $0x8] sm:$0xff] %vm130_vm7, %v139_v58   ;;  %131 = vst.msk [vmem:[%s389_s1] sm:$0xff] %vm130_vm7, %v129_v59  }
  0x8e   :  { %v160_v60 = vpop.permute.xlu1 %159   ;;  %v150_v61 = vpop.permute.xlu0 %149  }
  0x8f   :  { %201 = vst.msk [vmem:[%s389_s1 + $0x8] sm:$0xff] %vm151_vm8, %v160_v60   ;;  %152 = vst.msk [vmem:[%s389_s1] sm:$0xff] %vm151_vm8, %v150_v61  }

// kernel: _lambda_.1
= control target key start
LH: loop header
LB: loop body
LE: loop exit
PB: predicated region body
PF: predicated region fallthrough
CT: control target
= control target key end

     0   :  { %s4315_s17 = smov 0   ;;  %s5462_s0 = inlined_call_operand.vmem [shape: f32[2,6,10,128], index: 0, kind: input, shape index: {}]   ;;  %s5463_s1 = inlined_call_operand.vmem [shape: f32[3,3,128,128], index: 1, kind: input, shape index: {}]   ;;  %s5464_s2 = inlined_call_operand.vmem [shape: f32[1,128], index: 2, kind: input, shape index: {}]   ;;  %s5465_s3 = inlined_call_operand.vmem [shape: f32[3,3,128,128], index: 3, kind: input, shape index: {}]   ;;  %s5466_s4 = inlined_call_operand.vmem [shape: f32[1,128], index: 4, kind: input, shape index: {}]   ;;  %s5467_s5 = inlined_call_operand.vmem [shape: f32[16,4], index: 5, kind: input, shape index: {}]   ;;  %s5468_s6 = inlined_call_operand.vmem [shape: f32[1,4], index: 6, kind: input, shape index: {}]   ;;  %s5469_s7 = inlined_call_operand.vmem [shape: f32[4,16], index: 7, kind: input, shape index: {}]   ;;  %s5470_s8 = inlined_call_operand.vmem [shape: f32[1,16], index: 8, kind: input, shape index: {}]   ;;  %s5471_s9 = inlined_call_operand.vmem [shape: f32[128,16], index: 9, kind: input, shape index: {}]   ;;  %s5472_s10 = inlined_call_operand.vmem [shape: f32[16,128], index: 10, kind: input, shape index: {}]   ;;  %s5473_s11 = inlined_call_operand.vmem [shape: f32[2,32,128], index: 11, kind: output, shape index: {}]  }
   0x1 LB: > { %s2804_s18 = sadd.s32 4294967295, %s4251_s17   ;;  %p2808_p0 = scmp.ge.s32.totalorder %s4251_s17, 1  ;;  %s4251_s17 = sphi %s4315_s17, %s21_s17  }
   0x2   : > { %p337_p1 = scmp.lt.s32.totalorder %s4251_s17, 3 }
   0x4   : > { %p338_p2 = pnand %p2808_p0, %p337_p1 }
   0x5   : > { %p377_p3 = scmp.lt.s32.totalorder (!%p338_p2), %s2804_s18, 1 }
   0x6   : > { %341 = sbr.rel (%p338_p2) target bundleno = 1567 (0x61f), region = 64 }
   0xb   : > { %v2827_v0 = vld [vmem:[%s5463_s1 + $0xf8] sm:$0xff]  ;;  %v2826_v2 = vld [vmem:[%s5463_s1 + $0xf0] sm:$0xff]  ;;  %v2825_v4 = vld [vmem:[%s5463_s1 + $0xe8] sm:$0xff]  ;;  %s5475_s18 = smov (!%p377_p3, %s2804_s18), 1  ;;  %vm4254_vm0 = vmmov 0   ;;  %vm2493_vm1 = vcmask 130048  }
   0xc   : > { %v406_v1 = vld [vmem:[%s5463_s1 + $0x78] sm:$0xff]  ;;  %3491 = vmatprep.subr.mxu0 %v2827_v0  ;;  %v405_v3 = vld [vmem:[%s5463_s1 + $0x70] sm:$0xff]  ;;  %v404_v5 = vld [vmem:[%s5463_s1 + $0x68] sm:$0xff]  ;;  %s4229_s20 = smul.u32 96, %s5475_s18  ;;  %vm2574_vm2 = vcmask 1043456   ;;  %vm2570_vm3 = vcmask 31744  }
   0xd   : > { %3529 = vmatprep.subr.mxu1 %v406_v1  ;;  %3492 = vmatpush3.msra.mxu0 %v2827_v0  ;;  %v2824_v6 = vld [vmem:[%s5463_s1 + $0xe0] sm:$0xff]  ;;  %v2823_v8 = vld [vmem:[%s5463_s1 + $0xd8] sm:$0xff]  ;;  %v2822_v10 = vld [vmem:[%s5463_s1 + $0xd0] sm:$0xff]  ;;  %s3105_s21 = sshll.u32 %s5475_s18, 5 }
   0xe   : > { %3530 = vmatpush3.msra.mxu1 %v406_v1  ;;  %3493 = vmatprep.subr.mxu0 %v2826_v2  ;;  %v403_v7 = vld [vmem:[%s5463_s1 + $0x60] sm:$0xff]  ;;  %v402_v9 = vld [vmem:[%s5463_s1 + $0x58] sm:$0xff]  ;;  %v401_v11 = vld [vmem:[%s5463_s1 + $0x50] sm:$0xff]  ;;  %s4423_s12 = scalar_lea.vmem %s5462_s0, %s4229_s20  ;;  %s386_s24 = scalar_lea.vmem %s5473_s11, %s3105_s21 }
   0xf   : > { %3531 = vmatprep.subr.mxu1 %v405_v3  ;;  %3494 = vmatpush3.msra.mxu0 %v2826_v2  ;;  %v2821_v12 = vld [vmem:[%s5463_s1 + $0xc8] sm:$0xff]  ;;  %v2820_v14 = vld [vmem:[%s5463_s1 + $0xc0] sm:$0xff]  ;;  %v2819_v16 = vld [vmem:[%s5463_s1 + $0xb8] sm:$0xff] }
  0x10   : > { %3532 = vmatpush3.msra.mxu1 %v405_v3  ;;  %3495 = vmatprep.subr.mxu0 %v2825_v4  ;;  %v400_v13 = vld [vmem:[%s5463_s1 + $0x48] sm:$0xff]  ;;  %v399_v15 = vld [vmem:[%s5463_s1 + $0x40] sm:$0xff]  ;;  %v398_v17 = vld [vmem:[%s5463_s1 + $0x38] sm:$0xff] }
  0x11   : > { %3533 = vmatprep.subr.mxu1 %v404_v5  ;;  %3496 = vmatpush3.msra.mxu0 %v2825_v4  ;;  %v2818_v18 = vld [vmem:[%s5463_s1 + $0xb0] sm:$0xff]  ;;  %v2817_v20 = vld [vmem:[%s5463_s1 + $0xa8] sm:$0xff]  ;;  %v2816_v22 = vld [vmem:[%s5463_s1 + $0xa0] sm:$0xff] }
  0x12   : > { %3534 = vmatpush3.msra.mxu1 %v404_v5  ;;  %3497 = vmatprep.subr.mxu0 %v2824_v6  ;;  %v397_v19 = vld [vmem:[%s5463_s1 + $0x30] sm:$0xff]  ;;  %v396_v21 = vld [vmem:[%s5463_s1 + $0x28] sm:$0xff]  ;;  %v395_v23 = vld [vmem:[%s5463_s1 + $0x20] sm:$0xff] }
  0x13   : > { %3535 = vmatprep.subr.mxu1 %v403_v7  ;;  %3498 = vmatpush3.msra.mxu0 %v2824_v6  ;;  %v2815_v24 = vld [vmem:[%s5463_s1 + $0x98] sm:$0xff]  ;;  %v2814_v26 = vld [vmem:[%s5463_s1 + $0x90] sm:$0xff]  ;;  %v2813_v28 = vld [vmem:[%s5463_s1 + $0x88] sm:$0xff] }
  0x14   : > { %3536 = vmatpush3.msra.mxu1 %v403_v7  ;;  %3499 = vmatprep.subr.mxu0 %v2823_v8  ;;  %v394_v25 = vld [vmem:[%s5463_s1 + $0x18] sm:$0xff]  ;;  %v393_v27 = vld [vmem:[%s5463_s1 + $0x10] sm:$0xff]  ;;  %v392_v29 = vld [vmem:[%s5463_s1 + $0x8] sm:$0xff] }
  0x15   : > { %3537 = vmatprep.subr.mxu1 %v402_v9  ;;  %3500 = vmatpush3.msra.mxu0 %v2823_v8  ;;  %v2812_v30 = vld [vmem:[%s5463_s1 + $0x80] sm:$0xff]  ;;  %v4434_v34 = vld [vmem:[%s4423_s12 + $0x11] sm:$0xff]  ;;  %v2841_v40 = vld [vmem:[%s5463_s1 + $0x168] sm:$0xff] }
  0x16   : > { %3538 = vmatpush3.msra.mxu1 %v402_v9  ;;  %3501 = vmatprep.subr.mxu0 %v2822_v10  ;;  %v391_v31 = vld [vmem:[%s5463_s1] sm:$0xff]  ;;  %v4437_v35 = vld [vmem:[%s4423_s12 + $0x10] sm:$0xff]  ;;  %v2843_v36 = vld [vmem:[%s5463_s1 + $0x178] sm:$0xff] }
  0x17   : > { %3539 = vmatprep.subr.mxu1 %v401_v11  ;;  %3502 = vmatpush3.msra.mxu0 %v2822_v10  ;;  %v407_v32 = vld [vmem:[%s4423_s12 + $0x1] sm:$0xff]  ;;  %v2863_v37 = vld [vmem:[%s5463_s1 + $0x1f8] sm:$0xff]  ;;  %v2842_v38 = vld [vmem:[%s5463_s1 + $0x170] sm:$0xff] }
  0x18   : > { %3540 = vmatpush3.msra.mxu1 %v401_v11  ;;  %3503 = vmatprep.subr.mxu0 %v2821_v12  ;;  %v387_v33 = vld [vmem:[%s4423_s12] sm:$0xff]  ;;  %v2862_v39 = vld [vmem:[%s5463_s1 + $0x1f0] sm:$0xff]  ;;  %v2861_v41 = vld [vmem:[%s5463_s1 + $0x1e8] sm:$0xff] }
  0x19   : > { %3541 = vmatprep.subr.mxu1 %v400_v13  ;;  %3504 = vmatpush3.msra.mxu0 %v2821_v12  ;;  %v2840_v42 = vld [vmem:[%s5463_s1 + $0x160] sm:$0xff]  ;;  %v2839_v44 = vld [vmem:[%s5463_s1 + $0x158] sm:$0xff]  ;;  %v2838_v46 = vld [vmem:[%s5463_s1 + $0x150] sm:$0xff] }
  0x1a   : > { %3542 = vmatpush3.msra.mxu1 %v400_v13  ;;  %3505 = vmatprep.subr.mxu0 %v2820_v14  ;;  %v2860_v43 = vld [vmem:[%s5463_s1 + $0x1e0] sm:$0xff]  ;;  %v2859_v45 = vld [vmem:[%s5463_s1 + $0x1d8] sm:$0xff]  ;;  %v2858_v47 = vld [vmem:[%s5463_s1 + $0x1d0] sm:$0xff] }
  0x1b   : > { %3543 = vmatprep.subr.mxu1 %v399_v15  ;;  %3506 = vmatpush3.msra.mxu0 %v2820_v14  ;;  %v2837_v48 = vld [vmem:[%s5463_s1 + $0x148] sm:$0xff]  ;;  %v2836_v50 = vld [vmem:[%s5463_s1 + $0x140] sm:$0xff]  ;;  %v2835_v52 = vld [vmem:[%s5463_s1 + $0x138] sm:$0xff] }
  0x1c   : > { %3544 = vmatpush3.msra.mxu1 %v399_v15  ;;  %3507 = vmatprep.subr.mxu0 %v2819_v16  ;;  %v2857_v49 = vld [vmem:[%s5463_s1 + $0x1c8] sm:$0xff]  ;;  %v2856_v51 = vld [vmem:[%s5463_s1 + $0x1c0] sm:$0xff]  ;;  %v2855_v53 = vld [vmem:[%s5463_s1 + $0x1b8] sm:$0xff] }
  0x1d   : > { %3545 = vmatprep.subr.mxu1 %v398_v17  ;;  %3508 = vmatpush3.msra.mxu0 %v2819_v16  ;;  %v2834_v54 = vld [vmem:[%s5463_s1 + $0x130] sm:$0xff]  ;;  %v2833_v56 = vld [vmem:[%s5463_s1 + $0x128] sm:$0xff]  ;;  %v2832_v58 = vld [vmem:[%s5463_s1 + $0x120] sm:$0xff] }
  0x1e   : > { %3546 = vmatpush3.msra.mxu1 %v398_v17  ;;  %3509 = vmatprep.subr.mxu0 %v2818_v18  ;;  %v2854_v55 = vld [vmem:[%s5463_s1 + $0x1b0] sm:$0xff]  ;;  %v2853_v57 = vld [vmem:[%s5463_s1 + $0x1a8] sm:$0xff]  ;;  %v2852_v59 = vld [vmem:[%s5463_s1 + $0x1a0] sm:$0xff] }
  0x1f   : > { %3547 = vmatprep.subr.mxu1 %v397_v19  ;;  %3510 = vmatpush3.msra.mxu0 %v2818_v18  ;;  %v2831_v60 = vld [vmem:[%s5463_s1 + $0x118] sm:$0xff]  ;;  %v4517_v61 = vld [vmem:[%s4423_s12 + $0x21] sm:$0xff]  ;;  %v2830_v63 = vld [vmem:[%s5463_s1 + $0x110] sm:$0xff] }
  0x20   : > { %3548 = vmatpush3.msra.mxu1 %v397_v19  ;;  %3511 = vmatprep.subr.mxu0 %v2817_v20  ;;  %v4520_v62 = vld [vmem:[%s4423_s12 + $0x20] sm:$0xff]  ;;  %v2851_v0 = vld [vmem:[%s5463_s1 + $0x198] sm:$0xff]  ;;  %v4533_v2 = vld [vmem:[%s4423_s12 + $0x30] sm:$0xff] }
  0x21   : > { %3549 = vmatprep.subr.mxu1 %v396_v21  ;;  %3512 = vmatpush3.msra.mxu0 %v2817_v20  ;;  %v4530_v1 = vld [vmem:[%s4423_s12 + $0x31] sm:$0xff]  ;;  %v2829_v3 = vld [vmem:[%s5463_s1 + $0x108] sm:$0xff]  ;;  %v2828_v5 = vld [vmem:[%s5463_s1 + $0x100] sm:$0xff] }
  0x22   : > { %3550 = vmatpush3.msra.mxu1 %v396_v21  ;;  %3513 = vmatprep.subr.mxu0 %v2816_v22  ;;  %v2850_v4 = vld [vmem:[%s5463_s1 + $0x190] sm:$0xff]  ;;  %v2849_v6 = vld [vmem:[%s5463_s1 + $0x188] sm:$0xff]  ;;  %v2848_v9 = vld [vmem:[%s5463_s1 + $0x180] sm:$0xff] }
  0x23   : > { %3551 = vmatprep.subr.mxu1 %v395_v23  ;;  %3514 = vmatpush3.msra.mxu0 %v2816_v22  ;;  %v598_v7 = vld [vmem:[%s4423_s12 + $0x2] sm:$0xff]  ;;  %v4552_v8 = vld [vmem:[%s4423_s12 + $0x12] sm:$0xff] }
  0x24   : > { %3552 = vmatpush3.msra.mxu1 %v395_v23  ;;  %3515 = vmatprep.subr.mxu0 %v2815_v24  ;;  %v2883_v10 = vld [vmem:[%s5463_s1 + $0x278] sm:$0xff]  ;;  %v2882_v11 = vld [vmem:[%s5463_s1 + $0x270] sm:$0xff]  ;;  %v4569_v13 = vld [vmem:[%s4423_s12 + $0x22] sm:$0xff] }
  0x25   : > { %3553 = vmatprep.subr.mxu1 %v394_v25  ;;  %3516 = vmatpush3.msra.mxu0 %v2815_v24  ;;  %v2903_v12 = vld [vmem:[%s5463_s1 + $0x2f8] sm:$0xff]  ;;  %v2881_v15 = vld [vmem:[%s5463_s1 + $0x268] sm:$0xff]  ;;  %v2902_v16 = vld [vmem:[%s5463_s1 + $0x2f0] sm:$0xff] }
  0x26   : > { %3554 = vmatpush3.msra.mxu1 %v394_v25  ;;  %3517 = vmatprep.subr.mxu0 %v2814_v26  ;;  %v4573_v14 = vld [vmem:[%s4423_s12 + $0x32] sm:$0xff]  ;;  %v2880_v17 = vld [vmem:[%s5463_s1 + $0x260] sm:$0xff]  ;;  %v2901_v19 = vld [vmem:[%s5463_s1 + $0x2e8] sm:$0xff] }
  0x27   : > { %3555 = vmatprep.subr.mxu1 %v393_v27  ;;  %3518 = vmatpush3.msra.mxu0 %v2814_v26  ;;  %v4587_v18 = vld [vmem:[%s4423_s12 + $0x40] sm:$0xff]  ;;  %v2879_v20 = vld [vmem:[%s5463_s1 + $0x258] sm:$0xff]  ;;  %v2878_v22 = vld [vmem:[%s5463_s1 + $0x250] sm:$0xff] }
  0x28   : > { %3556 = vmatpush3.msra.mxu1 %v393_v27  ;;  %3519 = vmatprep.subr.mxu0 %v2813_v28  ;;  %v2900_v21 = vld [vmem:[%s5463_s1 + $0x2e0] sm:$0xff]  ;;  %v2899_v23 = vld [vmem:[%s5463_s1 + $0x2d8] sm:$0xff]  ;;  %v2877_v24 = vld [vmem:[%s5463_s1 + $0x248] sm:$0xff] }
  0x29   : > { %3557 = vmatprep.subr.mxu1 %v392_v29  ;;  %3520 = vmatpush3.msra.mxu0 %v2813_v28  ;;  %v2898_v25 = vld [vmem:[%s5463_s1 + $0x2d0] sm:$0xff]  ;;  %v2876_v26 = vld [vmem:[%s5463_s1 + $0x240] sm:$0xff]  ;;  %v2897_v27 = vld [vmem:[%s5463_s1 + $0x2c8] sm:$0xff] }
  0x2a   : > { %3558 = vmatpush3.msra.mxu1 %v392_v29  ;;  %3521 = vmatprep.subr.mxu0 %v2812_v30  ;;  %v2875_v28 = vld [vmem:[%s5463_s1 + $0x238] sm:$0xff]  ;;  %v2896_v29 = vld [vmem:[%s5463_s1 + $0x2c0] sm:$0xff] }
  0x2b   : > { %3559 = vmatprep.subr.mxu1 %v391_v31  ;;  %3522 = vmatpush3.msra.mxu0 %v2812_v30  ;;  %v2874_v30 = vld [vmem:[%s5463_s1 + $0x230] sm:$0xff] }
  0x2c   : > { %3523 = vmatprep.mubr.f32.mxu0 %v407_v32  ;;  %3560 = vmatpush3.msra.mxu1 %v391_v31  ;;  %v2895_v31 = vld [vmem:[%s5463_s1 + $0x2b8] sm:$0xff]  ;;  %v2873_v32 = vld [vmem:[%s5463_s1 + $0x228] sm:$0xff] }
  0x2d   : > { %3561 = vmatprep.mubr.f32.mxu1 %v387_v33  ;;  %3524 = vmatmul.mubr.f32.vlgmr.msra.gmra.mxu0 %v4434_v34  ;;  %v2894_v33 = vld [vmem:[%s5463_s1 + $0x2b0] sm:$0xff] }
  0x2e   : > { %3562 = vmatmul.mubr.f32.vlgmr.msra.gmra.mxu1 %v4437_v35  ;;  %3567 = vmatprep.subr.mxu0 %v2843_v36 }
  0x2f   : > { %3605 = vmatprep.subr.mxu1 %v2863_v37  ;;  %3568 = vmatpush3.msra.mxu0 %v2843_v36  ;;  %v2893_v36 = vld [vmem:[%s5463_s1 + $0x2a8] sm:$0xff] }
  0x30   : > { %3606 = vmatpush3.msra.mxu1 %v2863_v37  ;;  %3569 = vmatprep.subr.mxu0 %v2842_v38  ;;  %v2871_v37 = vld [vmem:[%s5463_s1 + $0x218] sm:$0xff] }
  0x31   : > { %3607 = vmatprep.subr.mxu1 %v2862_v39  ;;  %3570 = vmatpush3.msra.mxu0 %v2842_v38  ;;  %v2892_v38 = vld [vmem:[%s5463_s1 + $0x2a0] sm:$0xff] }
  0x32   : > { %3608 = vmatpush3.msra.mxu1 %v2862_v39  ;;  %3571 = vmatprep.subr.mxu0 %v2841_v40  ;;  %v2870_v39 = vld [vmem:[%s5463_s1 + $0x210] sm:$0xff] }
  0x33   : > { %3609 = vmatprep.subr.mxu1 %v2861_v41  ;;  %3572 = vmatpush3.msra.mxu0 %v2841_v40  ;;  %v2891_v40 = vld [vmem:[%s5463_s1 + $0x298] sm:$0xff] }
  0x34   : > { %3610 = vmatpush3.msra.mxu1 %v2861_v41  ;;  %3573 = vmatprep.subr.mxu0 %v2840_v42  ;;  %v2869_v41 = vld [vmem:[%s5463_s1 + $0x208] sm:$0xff] }
  0x35   : > { %3611 = vmatprep.subr.mxu1 %v2860_v43  ;;  %3574 = vmatpush3.msra.mxu0 %v2840_v42  ;;  %v2890_v42 = vld [vmem:[%s5463_s1 + $0x290] sm:$0xff] }
  0x36   : > { %3612 = vmatpush3.msra.mxu1 %v2860_v43  ;;  %3575 = vmatprep.subr.mxu0 %v2839_v44  ;;  %v2868_v43 = vld [vmem:[%s5463_s1 + $0x200] sm:$0xff] }
  0x37   : > { %3613 = vmatprep.subr.mxu1 %v2859_v45  ;;  %3576 = vmatpush3.msra.mxu0 %v2839_v44  ;;  %v2889_v44 = vld [vmem:[%s5463_s1 + $0x288] sm:$0xff] }
  0x38   : > { %3614 = vmatpush3.msra.mxu1 %v2859_v45  ;;  %3577 = vmatprep.subr.mxu0 %v2838_v46  ;;  %v2888_v45 = vld [vmem:[%s5463_s1 + $0x280] sm:$0xff] }
  0x39   : > { %3615 = vmatprep.subr.mxu1 %v2858_v47  ;;  %3578 = vmatpush3.msra.mxu0 %v2838_v46  ;;  %v2923_v46 = vld [vmem:[%s5463_s1 + $0x378] sm:$0xff] }
  0x3a   : > { %3616 = vmatpush3.msra.mxu1 %v2858_v47  ;;  %3579 = vmatprep.subr.mxu0 %v2837_v48  ;;  %v2922_v47 = vld [vmem:[%s5463_s1 + $0x370] sm:$0xff] }
  0x3b   : > { %3617 = vmatprep.subr.mxu1 %v2857_v49  ;;  %3580 = vmatpush3.msra.mxu0 %v2837_v48  ;;  %v2943_v48 = vld [vmem:[%s5463_s1 + $0x3f8] sm:$0xff] }
  0x3c   : > { %3618 = vmatpush3.msra.mxu1 %v2857_v49  ;;  %3581 = vmatprep.subr.mxu0 %v2836_v50  ;;  %v2921_v49 = vld [vmem:[%s5463_s1 + $0x368] sm:$0xff] }
  0x3d   : > { %3619 = vmatprep.subr.mxu1 %v2856_v51  ;;  %3582 = vmatpush3.msra.mxu0 %v2836_v50  ;;  %v2942_v50 = vld [vmem:[%s5463_s1 + $0x3f0] sm:$0xff] }
  0x3e   : > { %3620 = vmatpush3.msra.mxu1 %v2856_v51  ;;  %3583 = vmatprep.subr.mxu0 %v2835_v52  ;;  %v2920_v51 = vld [vmem:[%s5463_s1 + $0x360] sm:$0xff] }
  0x3f   : > { %3621 = vmatprep.subr.mxu1 %v2855_v53  ;;  %3584 = vmatpush3.msra.mxu0 %v2835_v52  ;;  %v4697_v52 = vld [vmem:[%s4423_s12 + $0x42] sm:$0xff] }
  0x40   : > { %3622 = vmatpush3.msra.mxu1 %v2855_v53  ;;  %3585 = vmatprep.subr.mxu0 %v2834_v54  ;;  %v2941_v53 = vld [vmem:[%s5463_s1 + $0x3e8] sm:$0xff] }
  0x41   : > { %3623 = vmatprep.subr.mxu1 %v2854_v55  ;;  %3586 = vmatpush3.msra.mxu0 %v2834_v54  ;;  %v2919_v54 = vld [vmem:[%s5463_s1 + $0x358] sm:$0xff] }
  0x42   : > { %3624 = vmatpush3.msra.mxu1 %v2854_v55  ;;  %3587 = vmatprep.subr.mxu0 %v2833_v56  ;;  %v2940_v55 = vld [vmem:[%s5463_s1 + $0x3e0] sm:$0xff] }
  0x43   : > { %3625 = vmatprep.subr.mxu1 %v2853_v57  ;;  %3588 = vmatpush3.msra.mxu0 %v2833_v56  ;;  %v2918_v56 = vld [vmem:[%s5463_s1 + $0x350] sm:$0xff] }
  0x44   : > { %3626 = vmatpush3.msra.mxu1 %v2853_v57  ;;  %3589 = vmatprep.subr.mxu0 %v2832_v58  ;;  %v2939_v57 = vld [vmem:[%s5463_s1 + $0x3d8] sm:$0xff] }
  0x45   : > { %3627 = vmatprep.subr.mxu1 %v2852_v59  ;;  %3590 = vmatpush3.msra.mxu0 %v2832_v58  ;;  %v2917_v58 = vld [vmem:[%s5463_s1 + $0x348] sm:$0xff] }
  0x46   : > { %3628 = vmatpush3.msra.mxu1 %v2852_v59  ;;  %3591 = vmatprep.subr.mxu0 %v2831_v60  ;;  %v2938_v59 = vld [vmem:[%s5463_s1 + $0x3d0] sm:$0xff] }
  0x47   : > { %3526 = vmatprep.mubr.f32.mxu0 %v4517_v61  ;;  %3592 = vmatpush3.msra.mxu0 %v2831_v60  ;;  %v2916_v60 = vld [vmem:[%s5463_s1 + $0x340] sm:$0xff] }
  0x48   : > { %3564 = vmatprep.mubr.f32.mxu1 %v4520_v62  ;;  %3593 = vmatprep.subr.mxu0 %v2830_v63 }
  0x49   : > { %3629 = vmatprep.subr.mxu1 %v2851_v0  ;;  %3527 = vmatmul.mubr.f32.gmra.mxu0 %v4530_v1 }
  0x4a   : > { %3565 = vmatmul.mubr.f32.gmra.mxu1 %v4533_v2  ;;  %3594 = vmatpush3.msra.mxu0 %v2830_v63  ;;  %v2937_v63 = vld [vmem:[%s5463_s1 + $0x3c8] sm:$0xff] }
  0x4b   : > { %3630 = vmatpush3.msra.mxu1 %v2851_v0  ;;  %3595 = vmatprep.subr.mxu0 %v2829_v3  ;;  %v2915_v0 = vld [vmem:[%s5463_s1 + $0x338] sm:$0xff] }
  0x4c   : > { %3631 = vmatprep.subr.mxu1 %v2850_v4  ;;  %3596 = vmatpush3.msra.mxu0 %v2829_v3  ;;  %v2936_v3 = vld [vmem:[%s5463_s1 + $0x3c0] sm:$0xff] }
  0x4d   : > { %3632 = vmatpush3.msra.mxu1 %v2850_v4  ;;  %3597 = vmatprep.subr.mxu0 %v2828_v5  ;;  %v2914_v4 = vld [vmem:[%s5463_s1 + $0x330] sm:$0xff] }
  0x4e   : > { %3633 = vmatprep.subr.mxu1 %v2849_v6  ;;  %3598 = vmatpush3.msra.mxu0 %v2828_v5  ;;  %v2935_v5 = vld [vmem:[%s5463_s1 + $0x3b8] sm:$0xff] }
  0x4f   : > { %3599 = vmatprep.mubr.f32.mxu0 %v598_v7  ;;  %3634 = vmatpush3.msra.mxu1 %v2849_v6  ;;  %v2913_v6 = vld [vmem:[%s5463_s1 + $0x328] sm:$0xff]  ;;  %v2934_v7 = vld [vmem:[%s5463_s1 + $0x3b0] sm:$0xff] }
  0x50   : > { %3600 = vmatmul.mubr.f32.vlgmr.msra.gmra.mxu0 %v4552_v8  ;;  %3635 = vmatprep.subr.mxu1 %v2848_v9 }
  0x51   : > { %3643 = vmatprep.subr.mxu0 %v2883_v10  ;;  %3636 = vmatpush3.msra.mxu1 %v2848_v9  ;;  %v2933_v9 = vld [vmem:[%s5463_s1 + $0x3a8] sm:$0xff] }
  0x52   : > { %3637 = vmatprep.mubr.f32.mxu1 %v4437_v35  ;;  %3644 = vmatpush3.msra.mxu0 %v2883_v10  ;;  %v2872_v35 = vld [vmem:[%s5463_s1 + $0x220] sm:$0xff]  ;;  %v2911_v10 = vld [vmem:[%s5463_s1 + $0x318] sm:$0xff] }
  0x53   : > { %3638 = vmatmul.mubr.f32.vlgmr.msra.gmra.mxu1 %v4520_v62  ;;  %3645 = vmatprep.subr.mxu0 %v2882_v11 }
  0x54   : > { %3681 = vmatprep.subr.mxu1 %v2903_v12  ;;  %3602 = vmatprep.mubr.f32.mxu0 %v4569_v13 }
  0x55   : > { %3646 = vmatpush3.msra.mxu0 %v2882_v11  ;;  %3682 = vmatpush3.msra.mxu1 %v2903_v12  ;;  %v2932_v11 = vld [vmem:[%s5463_s1 + $0x3a0] sm:$0xff]  ;;  %v2910_v12 = vld [vmem:[%s5463_s1 + $0x310] sm:$0xff] }
  0x56   : > { %3603 = vmatmul.mubr.f32.gmra.mxu0 %v4573_v14  ;;  %3647 = vmatprep.subr.mxu0 %v2881_v15 }
  0x57   : > { %3683 = vmatprep.subr.mxu1 %v2902_v16  ;;  %3640 = vmatprep.mubr.f32.mxu1 %v4533_v2 }
  0x58   : > { %3648 = vmatpush3.msra.mxu0 %v2881_v15  ;;  %3684 = vmatpush3.msra.mxu1 %v2902_v16  ;;  %v2931_v15 = vld [vmem:[%s5463_s1 + $0x398] sm:$0xff]  ;;  %v2909_v16 = vld [vmem:[%s5463_s1 + $0x308] sm:$0xff] }
  0x59   : > { %3649 = vmatprep.subr.mxu0 %v2880_v17  ;;  %3641 = vmatmul.mubr.f32.gmra.mxu1 %v4587_v18 }
  0x5a   : > { %3685 = vmatprep.subr.mxu1 %v2901_v19  ;;  %3650 = vmatpush3.msra.mxu0 %v2880_v17  ;;  %v2930_v17 = vld [vmem:[%s5463_s1 + $0x390] sm:$0xff] }
  0x5b   : > { %3686 = vmatpush3.msra.mxu1 %v2901_v19  ;;  %3651 = vmatprep.subr.mxu0 %v2879_v20  ;;  %v2908_v19 = vld [vmem:[%s5463_s1 + $0x300] sm:$0xff] }
  0x5c   : > { %3687 = vmatprep.subr.mxu1 %v2900_v21  ;;  %3652 = vmatpush3.msra.mxu0 %v2879_v20  ;;  %v2929_v20 = vld [vmem:[%s5463_s1 + $0x388] sm:$0xff] }
  0x5d   : > { %3688 = vmatpush3.msra.mxu1 %v2900_v21  ;;  %3653 = vmatprep.subr.mxu0 %v2878_v22  ;;  %v2928_v21 = vld [vmem:[%s5463_s1 + $0x380] sm:$0xff] }
  0x5e   : > { %3689 = vmatprep.subr.mxu1 %v2899_v23  ;;  %3654 = vmatpush3.msra.mxu0 %v2878_v22  ;;  %v2963_v22 = vld [vmem:[%s5463_s1 + $0x478] sm:$0xff] }
  0x5f   : > { %3690 = vmatpush3.msra.mxu1 %v2899_v23  ;;  %3655 = vmatprep.subr.mxu0 %v2877_v24  ;;  %v2962_v23 = vld [vmem:[%s5463_s1 + $0x470] sm:$0xff] }
  0x60   : > { %3691 = vmatprep.subr.mxu1 %v2898_v25  ;;  %3656 = vmatpush3.msra.mxu0 %v2877_v24  ;;  %v2907_v24 = vld [vmem:[%s4423_s12 + $0x50] sm:$0xff] }
  0x61   : > { %3692 = vmatpush3.msra.mxu1 %v2898_v25  ;;  %3657 = vmatprep.subr.mxu0 %v2876_v26  ;;  %v2960_v25 = vld [vmem:[%s5463_s1 + $0x460] sm:$0xff] }
  0x62   : > { %3693 = vmatprep.subr.mxu1 %v2897_v27  ;;  %3658 = vmatpush3.msra.mxu0 %v2876_v26  ;;  %v2956_v26 = vld [vmem:[%s5463_s1 + $0x440] sm:$0xff] }
  0x63   : > { %3694 = vmatpush3.msra.mxu1 %v2897_v27  ;;  %3659 = vmatprep.subr.mxu0 %v2875_v28  ;;  %v2954_v27 = vld [vmem:[%s5463_s1 + $0x430] sm:$0xff] }
  0x64   : > { %3695 = vmatprep.subr.mxu1 %v2896_v29  ;;  %3660 = vmatpush3.msra.mxu0 %v2875_v28  ;;  %v2953_v28 = vld [vmem:[%s5463_s1 + $0x428] sm:$0xff] }
  0x65   : > { %3696 = vmatpush3.msra.mxu1 %v2896_v29  ;;  %3661 = vmatprep.subr.mxu0 %v2874_v30  ;;  %v2952_v29 = vld [vmem:[%s5463_s1 + $0x420] sm:$0xff] }
  0x66   : > { %3697 = vmatprep.subr.mxu1 %v2895_v31  ;;  %3662 = vmatpush3.msra.mxu0 %v2874_v30  ;;  %v2951_v30 = vld [vmem:[%s5463_s1 + $0x418] sm:$0xff] }
  0x67   : > { %3698 = vmatpush3.msra.mxu1 %v2895_v31  ;;  %3663 = vmatprep.subr.mxu0 %v2873_v32  ;;  %v2950_v31 = vld [vmem:[%s5463_s1 + $0x410] sm:$0xff] }
  0x68   : > { %3699 = vmatprep.subr.mxu1 %v2894_v33  ;;  %3664 = vmatpush3.msra.mxu0 %v2873_v32  ;;  %v2949_v32 = vld [vmem:[%s5463_s1 + $0x408] sm:$0xff] }
  0x69   : > { %3700 = vmatpush3.msra.mxu1 %v2894_v33  ;;  %3665 = vmatprep.subr.mxu0 %v2872_v35  ;;  %v2948_v33 = vld [vmem:[%s5463_s1 + $0x400] sm:$0xff] }
  0x6a   : > { %3701 = vmatprep.subr.mxu1 %v2893_v36  ;;  %3666 = vmatpush3.msra.mxu0 %v2872_v35  ;;  %v2947_v35 = vld [vmem:[%s4423_s12 + $0x52] sm:$0xff] }
  0x6b   : > { %3702 = vmatpush3.msra.mxu1 %v2893_v36  ;;  %3667 = vmatprep.subr.mxu0 %v2871_v37  ;;  %v2980_v36 = vld [vmem:[%s5465_s3 + $0xf8] sm:$0xff] }
  0x6c   : > { %3703 = vmatprep.subr.mxu1 %v2892_v38  ;;  %3668 = vmatpush3.msra.mxu0 %v2871_v37  ;;  %v1421_v37 = vld [vmem:[%s5465_s3 + $0x78] sm:$0xff] }
  0x6d   : > { %3704 = vmatpush3.msra.mxu1 %v2892_v38  ;;  %3669 = vmatprep.subr.mxu0 %v2870_v39  ;;  %v2979_v38 = vld [vmem:[%s5465_s3 + $0xf0] sm:$0xff] }
  0x6e   : > { %3705 = vmatprep.subr.mxu1 %v2891_v40  ;;  %3670 = vmatpush3.msra.mxu0 %v2870_v39  ;;  %v2978_v39 = vld [vmem:[%s5465_s3 + $0xe8] sm:$0xff] }
  0x6f   : > { %3706 = vmatpush3.msra.mxu1 %v2891_v40  ;;  %3671 = vmatprep.subr.mxu0 %v2869_v41  ;;  %v1419_v40 = vld [vmem:[%s5465_s3 + $0x68] sm:$0xff] }
  0x70   : > { %3707 = vmatprep.subr.mxu1 %v2890_v42  ;;  %3672 = vmatpush3.msra.mxu0 %v2869_v41  ;;  %v2977_v41 = vld [vmem:[%s5465_s3 + $0xe0] sm:$0xff] }
  0x71   : > { %3708 = vmatpush3.msra.mxu1 %v2890_v42  ;;  %3673 = vmatprep.subr.mxu0 %v2868_v43  ;;  %v1418_v42 = vld [vmem:[%s5465_s3 + $0x60] sm:$0xff] }
  0x72   : > { %3709 = vmatprep.subr.mxu1 %v2889_v44  ;;  %3674 = vmatpush3.msra.mxu0 %v2868_v43  ;;  %v2976_v43 = vld [vmem:[%s5465_s3 + $0xd8] sm:$0xff] }
  0x73   : > { %3675 = vmatprep.mubr.f32.mxu0 %v4434_v34  ;;  %3710 = vmatpush3.msra.mxu1 %v2889_v44  ;;  %v4683_v34 = vld [vmem:[%s4423_s12 + $0x41] sm:$0xff]  ;;  %v1417_v44 = vld [vmem:[%s5465_s3 + $0x58] sm:$0xff] }
  0x74   : > { %3676 = vmatmul.mubr.f32.vlgmr.msra.gmra.mxu0 %v4517_v61  ;;  %3711 = vmatprep.subr.mxu1 %v2888_v45 }
  0x75   : > { %3719 = vmatprep.subr.mxu0 %v2923_v46  ;;  %3712 = vmatpush3.msra.mxu1 %v2888_v45  ;;  %v2975_v45 = vld [vmem:[%s5465_s3 + $0xd0] sm:$0xff] }
  0x76   : > { %3713 = vmatprep.mubr.f32.mxu1 %v4552_v8  ;;  %3720 = vmatpush3.msra.mxu0 %v2923_v46  ;;  %v2912_v8 = vld [vmem:[%s5463_s1 + $0x320] sm:$0xff]  ;;  %v1416_v46 = vld [vmem:[%s5465_s3 + $0x50] sm:$0xff] }
  0x77   : > { %3714 = vmatmul.mubr.f32.vlgmr.msra.gmra.mxu1 %v4569_v13  ;;  %3721 = vmatprep.subr.mxu0 %v2922_v47 }
  0x78   : > { %3757 = vmatprep.subr.mxu1 %v2943_v48  ;;  %3678 = vmatprep.mubr.f32.mxu0 %v4530_v1 }
  0x79   : > { %3722 = vmatpush3.msra.mxu0 %v2922_v47  ;;  %3758 = vmatpush3.msra.mxu1 %v2943_v48  ;;  %v2974_v47 = vld [vmem:[%s5465_s3 + $0xc8] sm:$0xff] }
  0x7a   : > { %3679 = vmatmul.mubr.f32.gmra.mxu0 %v4683_v34  ;;  %3723 = vmatprep.subr.mxu0 %v2921_v49  ;;  %v1415_v48 = vld [vmem:[%s5465_s3 + $0x48] sm:$0xff] }
  0x7b   : > { %3759 = vmatprep.subr.mxu1 %v2942_v50  ;;  %3716 = vmatprep.mubr.f32.mxu1 %v4573_v14 }
  0x7c   : > { %3724 = vmatpush3.msra.mxu0 %v2921_v49  ;;  %3760 = vmatpush3.msra.mxu1 %v2942_v50  ;;  %v1414_v49 = vld [vmem:[%s5465_s3 + $0x40] sm:$0xff]  ;;  %v2972_v50 = vld [vmem:[%s5465_s3 + $0xb8] sm:$0xff] }
  0x7d   : > { %3725 = vmatprep.subr.mxu0 %v2920_v51  ;;  %3717 = vmatmul.mubr.f32.gmra.mxu1 %v4697_v52 }
  0x7e   : > { %3761 = vmatprep.subr.mxu1 %v2941_v53  ;;  %3726 = vmatpush3.msra.mxu0 %v2920_v51  ;;  %v2971_v51 = vld [vmem:[%s5465_s3 + $0xb0] sm:$0xff] }
  0x7f   : > { %3762 = vmatpush3.msra.mxu1 %v2941_v53  ;;  %3727 = vmatprep.subr.mxu0 %v2919_v54  ;;  %v2969_v53 = vld [vmem:[%s5465_s3 + $0xa0] sm:$0xff] }
  0x80   : > { %3763 = vmatprep.subr.mxu1 %v2940_v55  ;;  %3728 = vmatpush3.msra.mxu0 %v2919_v54  ;;  %v1413_v54 = vld [vmem:[%s5465_s3 + $0x38] sm:$0xff] }
  0x81   : > { %3764 = vmatpush3.msra.mxu1 %v2940_v55  ;;  %3729 = vmatprep.subr.mxu0 %v2918_v56  ;;  %v2968_v55 = vld [vmem:[%s5465_s3 + $0x98] sm:$0xff] }
  0x82   : > { %3765 = vmatprep.subr.mxu1 %v2939_v57  ;;  %3730 = vmatpush3.msra.mxu0 %v2918_v56  ;;  %v4253_v56 = vmov 0.0  }
  0x83   : > { %3766 = vmatpush3.msra.mxu1 %v2939_v57  ;;  %3731 = vmatprep.subr.mxu0 %v2917_v58  ;;  %1389 = vst [vmem:[#allocation2 + $0x20] sm:$0xff] %v4253_v56  ;;  %1390 = vst [vmem:[#allocation2 + $0x28] sm:$0x3] %v4253_v56  ;;  %v1412_v57 = vld [vmem:[%s5465_s3 + $0x30] sm:$0xff] }
  0x84   : > { %3767 = vmatprep.subr.mxu1 %v2938_v59  ;;  %3732 = vmatpush3.msra.mxu0 %v2917_v58  ;;  %1385 = vst [vmem:[#allocation2] sm:$0xff] %v4253_v56  ;;  %1386 = vst [vmem:[#allocation2 + $0x8] sm:$0x3] %v4253_v56  ;;  %v2967_v58 = vld [vmem:[%s5465_s3 + $0x90] sm:$0xff] }
  0x85   : > { %3768 = vmatpush3.msra.mxu1 %v2938_v59  ;;  %3733 = vmatprep.subr.mxu0 %v2916_v60  ;;  %1387 = vst [vmem:[#allocation2 + $0x10] sm:$0xff] %v4253_v56  ;;  %1388 = vst [vmem:[#allocation2 + $0x18] sm:$0x3] %v4253_v56  ;;  %v1411_v59 = vld [vmem:[%s5465_s3 + $0x28] sm:$0xff] }
  0x86   : > { %3769 = vmatprep.subr.mxu1 %v2937_v63  ;;  %3734 = vmatpush3.msra.mxu0 %v2916_v60  ;;  %1391 = vst [vmem:[#allocation2 + $0x30] sm:$0xff] %v4253_v56  ;;  %1392 = vst [vmem:[#allocation2 + $0x38] sm:$0x3] %v4253_v56  ;;  %v2966_v60 = vld [vmem:[%s5465_s3 + $0x88] sm:$0xff] }
  0x87   : > { %3770 = vmatpush3.msra.mxu1 %v2937_v63  ;;  %3735 = vmatprep.subr.mxu0 %v2915_v0  ;;  %1393 = vst [vmem:[#allocation2 + $0x40] sm:$0xff] %v4253_v56  ;;  %1394 = vst [vmem:[#allocation2 + $0x48] sm:$0x3] %v4253_v56  ;;  %v1410_v63 = vld [vmem:[%s5465_s3 + $0x20] sm:$0xff] }
  0x88   : > { %3771 = vmatprep.subr.mxu1 %v2936_v3  ;;  %3736 = vmatpush3.msra.mxu0 %v2915_v0  ;;  %1395 = vst [vmem:[#allocation2 + $0x50] sm:$0xff] %v4253_v56  ;;  %1396 = vst [vmem:[#allocation2 + $0x58] sm:$0x3] %v4253_v56  ;;  %v2965_v0 = vld [vmem:[%s5465_s3 + $0x80] sm:$0xff] }
  0x89   : > { %3772 = vmatpush3.msra.mxu1 %v2936_v3  ;;  %3737 = vmatprep.subr.mxu0 %v2914_v4  ;;  %v1409_v3 = vld [vmem:[%s5465_s3 + $0x18] sm:$0xff] }
  0x8a   : > { %3773 = vmatprep.subr.mxu1 %v2935_v5  ;;  %3738 = vmatpush3.msra.mxu0 %v2914_v4 }
  0x8b   : > { %3774 = vmatpush3.msra.mxu1 %v2935_v5  ;;  %3739 = vmatprep.subr.mxu0 %v2913_v6  ;;  %v1422_v4 = vld [vmem:[#allocation2 + $0x1] sm:$0xff]  ;;  %v4941_v5 = vld [vmem:[%s5465_s3 + $0x178] sm:$0xff] }
  0x8c   : > { %3775 = vmatprep.subr.mxu1 %v2934_v7  ;;  %3740 = vmatpush3.msra.mxu0 %v2913_v6  ;;  %v1408_v6 = vld [vmem:[%s5465_s3 + $0x10] sm:$0xff] }
  0x8d   : > { %3776 = vmatpush3.msra.mxu1 %v2934_v7  ;;  %3741 = vmatprep.subr.mxu0 %v2912_v8  ;;  %v1407_v7 = vld [vmem:[%s5465_s3 + $0x8] sm:$0xff] }
  0x8e   : > { %3777 = vmatprep.subr.mxu1 %v2933_v9  ;;  %3742 = vmatpush3.msra.mxu0 %v2912_v8  ;;  %v1406_v8 = vld [vmem:[%s5465_s3] sm:$0xff] }
  0x8f   : > { %3778 = vmatpush3.msra.mxu1 %v2933_v9  ;;  %3743 = vmatprep.subr.mxu0 %v2911_v10  ;;  %v4957_v9 = vld [vmem:[%s5465_s3 + $0x1f8] sm:$0xff] }
  0x90   : > { %3779 = vmatprep.subr.mxu1 %v2932_v11  ;;  %3744 = vmatpush3.msra.mxu0 %v2911_v10 }
  0x91   : > { %3780 = vmatpush3.msra.mxu1 %v2932_v11  ;;  %3745 = vmatprep.subr.mxu0 %v2910_v12 }
  0x92   : > { %3781 = vmatprep.subr.mxu1 %v2931_v15  ;;  %3746 = vmatpush3.msra.mxu0 %v2910_v12 }
  0x93   : > { %3782 = vmatpush3.msra.mxu1 %v2931_v15  ;;  %3747 = vmatprep.subr.mxu0 %v2909_v16 }
  0x94   : > { %3783 = vmatprep.subr.mxu1 %v2930_v17  ;;  %3748 = vmatpush3.msra.mxu0 %v2909_v16 }
  0x95   : > { %3784 = vmatpush3.msra.mxu1 %v2930_v17  ;;  %3749 = vmatprep.subr.mxu0 %v2908_v19 }
  0x96   : > { %3785 = vmatprep.subr.mxu1 %v2929_v20  ;;  %3750 = vmatpush3.msra.mxu0 %v2908_v19 }
  0x97   : > { %3751 = vmatprep.mubr.f32.mxu0 %v4520_v62  ;;  %3786 = vmatpush3.msra.mxu1 %v2929_v20  ;;  %v2961_v62 = vld [vmem:[%s5463_s1 + $0x468] sm:$0xff] }
  0x98   : > { %3752 = vmatmul.mubr.f32.vlgmr.msra.gmra.mxu0 %v4533_v2  ;;  %3787 = vmatprep.subr.mxu1 %v2928_v21  ;;  %v2927_v2 = vld [vmem:[%s4423_s12 + $0x51] sm:$0xff] }
  0x99   : > { %3795 = vmatprep.subr.mxu0 %v2963_v22  ;;  %3788 = vmatpush3.msra.mxu1 %v2928_v21 }
  0x9a   : > { %3789 = vmatprep.mubr.f32.mxu1 %v4517_v61  ;;  %3796 = vmatpush3.msra.mxu0 %v2963_v22  ;;  %v2959_v61 = vld [vmem:[%s5463_s1 + $0x458] sm:$0xff] }
  0x9b   : > { %3790 = vmatmul.mubr.f32.vlgmr.msra.gmra.mxu1 %v4530_v1  ;;  %3797 = vmatprep.subr.mxu0 %v2962_v23  ;;  %v2958_v1 = vld [vmem:[%s5463_s1 + $0x450] sm:$0xff] }
  0x9c   : > { %3754 = vmatprep.mubr.f32.mxu0 %v4587_v18  ;;  %3798 = vmatpush3.msra.mxu0 %v2962_v23  ;;  %v2957_v18 = vld [vmem:[%s5463_s1 + $0x448] sm:$0xff] }
  0x9d   : > { %3792 = vmatprep.mubr.f32.mxu1 %v4683_v34  ;;  %3755 = vmatmul.mubr.f32.gmra.mxu0 %v2907_v24  ;;  %v2973_v34 = vld [vmem:[%s5465_s3 + $0xc0] sm:$0xff] }
  0x9e   : > { %3799 = vmatprep.subr.mxu0 %v2961_v62  ;;  %3827 = vmatprep.mubr.f32.mxu0 %v4569_v13  ;;  %v2955_v13 = vld [vmem:[%s5463_s1 + $0x438] sm:$0xff] }
  0x9f   : > { %3800 = vmatpush3.msra.mxu0 %v2961_v62  ;;  %3793 = vmatmul.mubr.f32.gmra.mxu1 %v2927_v2 }
  0xa0   : > { %3801 = vmatprep.subr.mxu0 %v2960_v25  ;;  %3833 = vmatprep.subr.mxu1 %v2980_v36 }
  0xa1   : > { %3802 = vmatpush3.msra.mxu0 %v2960_v25  ;;  %3834 = vmatpush3.msra.mxu1 %v2980_v36 }
  0xa2   : > { %3803 = vmatprep.subr.mxu0 %v2959_v61  ;;  %3835 = vmatprep.subr.mxu1 %v2979_v38 }
  0xa3   : > { %3804 = vmatpush3.msra.mxu0 %v2959_v61  ;;  %3836 = vmatpush3.msra.mxu1 %v2979_v38 }
  0xa4   : > { %3805 = vmatprep.subr.mxu0 %v2958_v1  ;;  %3837 = vmatprep.subr.mxu1 %v2978_v39 }
  0xa5   : > { %3806 = vmatpush3.msra.mxu0 %v2958_v1  ;;  %3838 = vmatpush3.msra.mxu1 %v2978_v39 }
  0xa6   : > { %3807 = vmatprep.subr.mxu0 %v2957_v18  ;;  %3839 = vmatprep.subr.mxu1 %v2977_v41 }
  0xa7   : > { %3808 = vmatpush3.msra.mxu0 %v2957_v18  ;;  %3840 = vmatpush3.msra.mxu1 %v2977_v41 }
  0xa8   : > { %3809 = vmatprep.subr.mxu0 %v2956_v26  ;;  %3841 = vmatprep.subr.mxu1 %v2976_v43 }
  0xa9   : > { %3810 = vmatpush3.msra.mxu0 %v2956_v26  ;;  %3842 = vmatpush3.msra.mxu1 %v2976_v43 }
  0xaa   : > { %3811 = vmatprep.subr.mxu0 %v2955_v13  ;;  %3843 = vmatprep.subr.mxu1 %v2975_v45 }
  0xab   : > { %3812 = vmatpush3.msra.mxu0 %v2955_v13  ;;  %3844 = vmatpush3.msra.mxu1 %v2975_v45 }
  0xac   : > { %3813 = vmatprep.subr.mxu0 %v2954_v27  ;;  %3845 = vmatprep.subr.mxu1 %v2974_v47 }
  0xad   : > { %3814 = vmatpush3.msra.mxu0 %v2954_v27  ;;  %3846 = vmatpush3.msra.mxu1 %v2974_v47 }
  0xae   : > { %3815 = vmatprep.subr.mxu0 %v2953_v28  ;;  %3847 = vmatprep.subr.mxu1 %v2973_v34 }
  0xaf   : > { %3816 = vmatpush3.msra.mxu0 %v2953_v28  ;;  %3848 = vmatpush3.msra.mxu1 %v2973_v34 }
  0xb0   : > { %3817 = vmatprep.subr.mxu0 %v2952_v29  ;;  %3849 = vmatprep.subr.mxu1 %v2972_v50 }
  0xb1   : > { %3818 = vmatpush3.msra.mxu0 %v2952_v29  ;;  %3850 = vmatpush3.msra.mxu1 %v2972_v50 }
  0xb2   : > { %3819 = vmatprep.subr.mxu0 %v2951_v30  ;;  %3851 = vmatprep.subr.mxu1 %v2971_v51 }
  0xb3   : > { %3820 = vmatpush3.msra.mxu0 %v2951_v30  ;;  %3852 = vmatpush3.msra.mxu1 %v2971_v51 }
  0xb4   : > { %3821 = vmatprep.subr.mxu0 %v2950_v31  ;;  %3865 = vmatprep.mubr.f32.mxu1 %v1422_v4 }
  0xb5   : > { %3822 = vmatpush3.msra.mxu0 %v2950_v31 }
  0xb6   : > { %3823 = vmatprep.subr.mxu0 %v2949_v32 }
  0xb7   : > { %3824 = vmatpush3.msra.mxu0 %v2949_v32 }
  0xb8   : > { %3825 = vmatprep.subr.mxu0 %v2948_v33 }
  0xb9   : > { %3826 = vmatpush3.msra.mxu0 %v2948_v33 }
  0xba   : > { %3828 = vmatmul.mubr.f32.vlgmr.msra.gmra.mxu0 %v4573_v14  ;;  %v1420_v14 = vld [vmem:[%s5465_s3 + $0x70] sm:$0xff]  ;;  %3871 = vmatprep.subr.mxu0 %v1421_v37 }
  0xbb   : > { %3830 = vmatprep.mubr.f32.mxu0 %v4697_v52  ;;  %3872 = vmatpush3.msra.mxu0 %v1421_v37  ;;  %v2970_v52 = vld [vmem:[%s5465_s3 + $0xa8] sm:$0xff] }
  0xbc   : > { %3873 = vmatprep.subr.mxu0 %v1420_v14  ;;  %3853 = vmatprep.subr.mxu1 %v2970_v52 }
  0xbd   : > { %3874 = vmatpush3.msra.mxu0 %v1420_v14  ;;  %3854 = vmatpush3.msra.mxu1 %v2970_v52 }
  0xbe   : > { %3831 = vmatmul.mubr.f32.gmra.mxu0 %v2947_v35  ;;  %3875 = vmatprep.subr.mxu0 %v1419_v40 }
  0xbf   : > { %3876 = vmatpush3.msra.mxu0 %v1419_v40  ;;  %3855 = vmatprep.subr.mxu1 %v2969_v53 }
  0xc0   : > { %3877 = vmatprep.subr.mxu0 %v1418_v42  ;;  %3856 = vmatpush3.msra.mxu1 %v2969_v53 }
  0xc1   : > { %3878 = vmatpush3.msra.mxu0 %v1418_v42  ;;  %3857 = vmatprep.subr.mxu1 %v2968_v55 }
  0xc2   : > { %3879 = vmatprep.subr.mxu0 %v1417_v44  ;;  %3858 = vmatpush3.msra.mxu1 %v2968_v55 }
  0xc3   : > { %3880 = vmatpush3.msra.mxu0 %v1417_v44  ;;  %3859 = vmatprep.subr.mxu1 %v2967_v58 }
  0xc4   : > { %3881 = vmatprep.subr.mxu0 %v1416_v46  ;;  %3860 = vmatpush3.msra.mxu1 %v2967_v58 }
  0xc5   : > { %3882 = vmatpush3.msra.mxu0 %v1416_v46  ;;  %3861 = vmatprep.subr.mxu1 %v2966_v60 }
  0xc6   : > { %3883 = vmatprep.subr.mxu0 %v1415_v48  ;;  %3862 = vmatpush3.msra.mxu1 %v2966_v60 }
  0xc7   : > { %3884 = vmatpush3.msra.mxu0 %v1415_v48  ;;  %3863 = vmatprep.subr.mxu1 %v2965_v0 }
  0xc8   : > { %3885 = vmatprep.subr.mxu0 %v1414_v49  ;;  %3864 = vmatpush3.msra.mxu1 %v2965_v0 }
  0xc9   : > { %3886 = vmatpush3.msra.mxu0 %v1414_v49  ;;  %3903 = vmatprep.mubr.f32.mxu0 %v4253_v56 }
  0xca   : > { %3887 = vmatprep.subr.mxu0 %v1413_v54  ;;  %3909 = vmatprep.subr.mxu1 %v4941_v5 }
  0xcb   : > { %3888 = vmatpush3.msra.mxu0 %v1413_v54 }
  0xcc   : > { %3889 = vmatprep.subr.mxu0 %v1412_v57 }
  0xcd   : > { %3890 = vmatpush3.msra.mxu0 %v1412_v57 }
  0xce   : > { %3891 = vmatprep.subr.mxu0 %v1411_v59 }
  0xcf   : > { %3892 = vmatpush3.msra.mxu0 %v1411_v59 }
  0xd0   : > { %3893 = vmatprep.subr.mxu0 %v1410_v63 }
  0xd1   : > { %3894 = vmatpush3.msra.mxu0 %v1410_v63 }
  0xd2   : > { %3895 = vmatprep.subr.mxu0 %v1409_v3 }
  0xd3   : > { %3896 = vmatpush3.msra.mxu0 %v1409_v3  ;;  %v2964_v3 = vld [vmem:[%s5464_s2] ss:$0 sm:$0xff] }
  0xd4   : > { %3897 = vmatprep.subr.mxu0 %v1408_v6 }
  0xd5   : > { %3898 = vmatpush3.msra.mxu0 %v1408_v6 }
  0xd6   : > { %3899 = vmatprep.subr.mxu0 %v1407_v7 }
  0xd7   : > { %3900 = vmatpush3.msra.mxu0 %v1407_v7 }
  0xd8   : > { %3901 = vmatprep.subr.mxu0 %v1406_v8 }
  0xd9   : > { %3902 = vmatpush3.msra.mxu0 %v1406_v8 }
  0xda   : > { %3947 = vmatprep.subr.mxu0 %v4957_v9 }
  0xed   : > { %v3525_v10 = vpop.f32.mrf.mxu0 }
  0xee   : > { %v3563_v12 = vpop.f32.mrf.mxu1 }
  0xef   : > { %v494_v11 = vpop.f32.mrf.mxu0  ;;  %v585_v28 = vadd.f32 %v3563_v12, %v3525_v10 }
  0xf0   : > { %v579_v16 = vpop.f32.mrf.mxu1 }
  0xf1   : > { %v580_v29 = vadd.f32 %v579_v16, %v494_v11 }
 0x109   : > { %v3528_v15 = vpop.f32.mrf.mxu0 }
 0x10a   : > { %v3566_v19 = vpop.f32.mrf.mxu1 }
 0x10b   : > { %v504_v17 = vpop.f32.mrf.mxu0  ;;  %v595_v33 = vadd.f32 %v3566_v19, %v3528_v15 }
 0x10c   : > { %v589_v21 = vpop.f32.mrf.mxu1 }
 0x10d   : > { %v590_v37 = vadd.f32 %v589_v21, %v504_v17 }
 0x110   : > { %v3601_v20 = vpop.f32.mrf.mxu0 }
 0x111   : > { %v705_v30 = vadd.f32 %v3601_v20, %v585_v28  ;;  %v3011_v28 = vld [vmem:[%s5465_s3 + $0x1f0] sm:$0xff] }
 0x112   : > { %v685_v22 = vpop.f32.mrf.mxu0 }
 0x113   : > { %v3639_v23 = vpop.f32.mrf.mxu1  ;;  %v704_v35 = vadd.f32 %v685_v22, %v580_v29 }
 0x114   : > { %v816_v38 = vadd.f32 %v3639_v23, %v705_v30  ;;  %v2991_v30 = vld [vmem:[%s5465_s3 + $0x150] sm:$0xff] }
 0x115   : > { %v796_v62 = vpop.f32.mrf.mxu1 }
 0x116   : > { %v3604_v24 = vpop.f32.mrf.mxu0  ;;  %v815_v40 = vadd.f32 %v796_v62, %v704_v35  ;;  %v3008_v35 = vld [vmem:[%s5465_s3 + $0x1d8] sm:$0xff] }
 0x117   : > { %v707_v14 = vadd.f32 %v3604_v24, %v595_v33  ;;  %v3009_v33 = vld [vmem:[%s5465_s3 + $0x1e0] sm:$0xff] }
 0x118   : > { %v695_v2 = vpop.f32.mrf.mxu0 }
 0x119   : > { %v3642_v25 = vpop.f32.mrf.mxu1  ;;  %v706_v41 = vadd.f32 %v695_v2, %v590_v37  ;;  %v2995_v2 = vld [vmem:[%s5465_s3 + $0x170] sm:$0xff] }
 0x11a   : > { %v818_v45 = vadd.f32 %v3642_v25, %v707_v14  ;;  %v3007_v37 = vld [vmem:[%s5465_s3 + $0x1d0] sm:$0xff]  ;;  %v3006_v14 = vld [vmem:[%s5465_s3 + $0x1c8] sm:$0xff] }
 0x11b   : > { %v806_v1 = vpop.f32.mrf.mxu1 }
 0x11c   : > { %v817_v47 = vadd.f32 %v806_v1, %v706_v41  ;;  %v2994_v1 = vld [vmem:[%s5465_s3 + $0x168] sm:$0xff] }
 0x11d   : > { %v2986_v41 = vld [vmem:[%s5465_s3 + $0x128] sm:$0xff] }
 0x134   : > { %v3677_v61 = vpop.f32.mrf.mxu0 }
 0x135   : > { %v926_v42 = vadd.f32 %v3677_v61, %v816_v38  ;;  %v2988_v38 = vld [vmem:[%s5465_s3 + $0x138] sm:$0xff] }
 0x136   : > { %v906_v18 = vpop.f32.mrf.mxu0 }
 0x137   : > { %v3715_v26 = vpop.f32.mrf.mxu1  ;;  %v925_v46 = vadd.f32 %v906_v18, %v815_v40  ;;  %v3005_v40 = vld [vmem:[%s5465_s3 + $0x1c0] sm:$0xff] }
 0x138   : > { %v1036_v48 = vadd.f32 %v3715_v26, %v926_v42  ;;  %v1613_v26 = vld [vmem:[#allocation2 + $0x2] sm:$0xff]  ;;  %v3004_v42 = vld [vmem:[%s5465_s3 + $0x1b8] sm:$0xff] }
 0x139   : > { %v1016_v27 = vpop.f32.mrf.mxu1 }
 0x13a   : > { %v3680_v13 = vpop.f32.mrf.mxu0  ;;  %v1035_v51 = vadd.f32 %v1016_v27, %v925_v46  ;;  %v3002_v46 = vld [vmem:[%s5465_s3 + $0x1a8] sm:$0xff] }
 0x13b   : > { %v928_v34 = vadd.f32 %v3680_v13, %v818_v45  ;;  %v2993_v13 = vld [vmem:[%s5465_s3 + $0x160] sm:$0xff]  ;;  %v2984_v45 = vld [vmem:[%s5465_s3 + $0x118] sm:$0xff] }
 0x13c   : > { %v916_v31 = vpop.f32.mrf.mxu0 }
 0x13d   : > { %v3718_v32 = vpop.f32.mrf.mxu1  ;;  %v927_v52 = vadd.f32 %v916_v31, %v817_v47  ;;  %v3010_v31 = vld [vmem:[%s5465_s3 + $0x1e8] sm:$0xff]  ;;  %v2983_v47 = vld [vmem:[%s5465_s3 + $0x110] sm:$0xff] }
 0x13e   : > { %v1038_v54 = vadd.f32 %v3718_v32, %v928_v34  ;;  %v2982_v34 = vld [vmem:[%s5465_s3 + $0x108] sm:$0xff] }
 0x13f   : > { %v1026_v39 = vpop.f32.mrf.mxu1 }
 0x140   : > { %v1037_v59 = vadd.f32 %v1026_v39, %v927_v52  ;;  %v2987_v39 = vld [vmem:[%s5465_s3 + $0x130] sm:$0xff]  ;;  %v2998_v52 = vld [vmem:[%s5465_s3 + $0x188] sm:$0xff] }
 0x158   : > { %v3753_v36 = vpop.f32.mrf.mxu0 }
 0x159   : > { %v1147_v53 = vadd.f32 %v3753_v36, %v1036_v48  ;;  %v2989_v36 = vld [vmem:[%s5465_s3 + $0x140] sm:$0xff] }
 0x15a   : > { %v1127_v43 = vpop.f32.mrf.mxu0  ;;  %v3001_v48 = vld [vmem:[%s5465_s3 + $0x1a0] sm:$0xff] }
 0x15b   : > { %v3791_v44 = vpop.f32.mrf.mxu1  ;;  %v1146_v55 = vadd.f32 %v1127_v43, %v1035_v51  ;;  %v2985_v43 = vld [vmem:[%s5465_s3 + $0x120] sm:$0xff]  ;;  %v2999_v51 = vld [vmem:[%s5465_s3 + $0x190] sm:$0xff] }
 0x15c   : > { %v1257_v60 = vadd.f32 %v3791_v44, %v1147_v53  ;;  %v3003_v44 = vld [vmem:[%s5465_s3 + $0x1b0] sm:$0xff]  ;;  %v3028_v53 = vld [vmem:[%s5465_s3 + $0x278] sm:$0xff] }
 0x15d   : > { %v3756_v49 = vpop.f32.mrf.mxu0  ;;  %v1237_v50 = vpop.f32.mrf.mxu1 }
 0x15e   : > { %v1149_v63 = vadd.f32 %v3756_v49, %v1038_v54  ;;  %v1256_v4 = vadd.f32 %v1237_v50, %v1146_v55  ;;  %v3000_v49 = vld [vmem:[%s5465_s3 + $0x198] sm:$0xff]  ;;  %v2981_v50 = vld [vmem:[%s5465_s3 + $0x100] sm:$0xff] }
 0x15f   : > { %v1137_v57 = vpop.f32.mrf.mxu0  ;;  %v3794_v58 = vpop.f32.mrf.mxu1  ;;  %v2997_v55 = vld [vmem:[%s5465_s3 + $0x180] sm:$0xff] }
 0x160   : > { %v1148_v6 = vadd.f32 %v1137_v57, %v1037_v59  ;;  %v1259_v11 = vadd.f32 %v3794_v58, %v1149_v63  ;;  %v3027_v58 = vld [vmem:[%s5465_s3 + $0x270] sm:$0xff]  ;;  %v3044_v59 = vld [vmem:[%s5465_s3 + $0x2f8] sm:$0xff]  ;;  %v3026_v63 = vld [vmem:[%s5465_s3 + $0x268] sm:$0xff] }
 0x161   : > { %v1247_v8 = vpop.f32.mrf.mxu1 }
 0x162   : > { %v1258_v17 = vadd.f32 %v1247_v8, %v1148_v6  ;;  %v3025_v6 = vld [vmem:[%s5465_s3 + $0x260] sm:$0xff]  ;;  %v3024_v8 = vld [vmem:[%s5465_s3 + $0x258] sm:$0xff] }
 0x17a   : > { %v3829_v0 = vpop.f32.mrf.mxu0 }
 0x17b   : > { %v1367_v7 = vadd.f32 %v3829_v0, %v1257_v60  ;;  %v3043_v60 = vld [vmem:[%s5465_s3 + $0x2f0] sm:$0xff] }
 0x17c   : > { %v1347_v10 = vpop.f32.mrf.mxu0 }
 0x17d   : > { %v1378_v12 = vadd.f32 %v2964_v3, %v1367_v7  ;;  %v1366_v15 = vadd.f32 %v1347_v10, %v1256_v4  ;;  %v3041_v7 = vld [vmem:[%s5465_s3 + $0x2e0] sm:$0xff]  ;;  %v3040_v10 = vld [vmem:[%s5465_s3 + $0x2d8] sm:$0xff] }
 0x17e   : > { %v3832_v16 = vpop.f32.mrf.mxu0 }
 0x17f   : > { %v4963_v19 = vmax.f32 %v1378_v12, 0.0  ;;  %v1377_v20 = vadd.f32 %v2964_v3, %v1366_v15  ;;  %v1369_v21 = vadd.f32 %v3832_v16, %v1259_v11  ;;  %v3023_v11 = vld [vmem:[%s5465_s3 + $0x250] sm:$0xff]  ;;  %v3022_v15 = vld [vmem:[%s5465_s3 + $0x248] sm:$0xff] }
 0x180   : > { %v1357_v22 = vpop.f32.mrf.mxu0  ;;  %v3039_v12 = vld [vmem:[%s5465_s3 + $0x2d0] sm:$0xff]  ;;  %v3038_v16 = vld [vmem:[%s5465_s3 + $0x2c8] sm:$0xff] }
 0x181   : > { %1399 = vst [vmem:[#allocation2 + $0x21] sm:$0xff] %v4963_v19  ;;  %v4966_v23 = vmax.f32 %v1377_v20, 0.0  ;;  %v1380_v24 = vadd.f32 %v2964_v3, %v1369_v21  ;;  %v1368_v62 = vadd.f32 %v1357_v22, %v1258_v17  ;;  %v3021_v17 = vld [vmem:[%s5465_s3 + $0x240] sm:$0xff]  ;;  %v3020_v21 = vld [vmem:[%s5465_s3 + $0x238] sm:$0xff] }
 0x182   : > { %v3037_v20 = vld [vmem:[%s5465_s3 + $0x2c0] sm:$0xff]  ;;  %v3036_v22 = vld [vmem:[%s5465_s3 + $0x2b8] sm:$0xff] }
 0x183   : > { %1398 = vst [vmem:[#allocation2 + $0x11] sm:$0xff] %v4966_v23  ;;  %v4972_v25 = vmax.f32 %v1380_v24, 0.0  ;;  %v1379_v61 = vadd.f32 %v2964_v3, %v1368_v62  ;;  %3866 = vmatmul.mubr.f32.vlgmr.msra.gmra.mxu1 %v4966_v23  ;;  %v3042_v3 = vld [vmem:[%s5465_s3 + $0x2e8] sm:$0xff]  ;;  %v3035_v24 = vld [vmem:[%s5465_s3 + $0x2b0] sm:$0xff] }
 0x184   : > { %3910 = vmatpush3.msra.mxu1 %v4941_v5  ;;  %3868 = vmatprep.mubr.f32.mxu1 %v4963_v19  ;;  %v2992_v5 = vld [vmem:[%s5465_s3 + $0x158] sm:$0xff]  ;;  %v3018_v62 = vld [vmem:[%s5465_s3 + $0x228] sm:$0xff] }
 0x185   : > { %1401 = vst [vmem:[#allocation2 + $0x41] sm:$0xff] %v4972_v25  ;;  %v4981_v18 = vmax.f32 %v1379_v61, 0.0  ;;  %3911 = vmatprep.subr.mxu1 %v2995_v2  ;;  %v3017_v61 = vld [vmem:[%s5465_s3 + $0x220] sm:$0xff] }
 0x186   : > { %3912 = vmatpush3.msra.mxu1 %v2995_v2  ;;  %v3034_v2 = vld [vmem:[%s5465_s3 + $0x2a8] sm:$0xff] }
 0x187   : > { %1400 = vst [vmem:[#allocation2 + $0x31] sm:$0xff] %v4981_v18  ;;  %3913 = vmatprep.subr.mxu1 %v2994_v1  ;;  %3869 = vmatmul.mubr.f32.gmra.mxu1 %v4981_v18 }
 0x188   : > { %3914 = vmatpush3.msra.mxu1 %v2994_v1  ;;  %3941 = vmatprep.mubr.f32.mxu1 %v1613_v26  ;;  %v4994_v29 = vld [vmem:[#allocation2 + $0x20] sm:$0xff]  ;;  %v3016_v26 = vld [vmem:[%s5465_s3 + $0x218] sm:$0xff] }
 0x189   : > { %3915 = vmatprep.subr.mxu1 %v2993_v13  ;;  %v5079_v57 = vld [vmem:[#allocation2 + $0x22] sm:$0xff] }
 0x18a   : > { %v1403_v27 = vld [vmem:[#allocation2 + $0x10] sm:$0xff]  ;;  %3916 = vmatpush3.msra.mxu1 %v2993_v13  ;;  %v3033_v1 = vld [vmem:[%s5465_s3 + $0x2a0] sm:$0xff]  ;;  %v3032_v13 = vld [vmem:[%s5465_s3 + $0x298] sm:$0xff] }
 0x18b   : > { %3904 = vmatmul.mubr.f32.vlgmr.msra.gmra.mxu0 %v1403_v27  ;;  %3917 = vmatprep.subr.mxu1 %v2992_v5  ;;  %v1614_v54 = vld [vmem:[#allocation2 + $0x12] sm:$0xff] }
 0x18c   : > { %3948 = vmatpush3.msra.mxu0 %v4957_v9  ;;  %3906 = vmatprep.mubr.f32.mxu0 %v4994_v29  ;;  %v2990_v9 = vld [vmem:[%s5465_s3 + $0x148] sm:$0xff]  ;;  %v5102_v4 = vld [vmem:[#allocation2 + $0x40] sm:$0xff] }
 0x18d   : > { %3949 = vmatprep.subr.mxu0 %v3011_v28  ;;  %3918 = vmatpush3.msra.mxu1 %v2992_v5  ;;  %v3015_v5 = vld [vmem:[%s5465_s3 + $0x210] sm:$0xff] }
 0x18e   : > { %3950 = vmatpush3.msra.mxu0 %v3011_v28  ;;  %v5004_v32 = vld [vmem:[#allocation2 + $0x30] sm:$0xff]  ;;  %3919 = vmatprep.subr.mxu1 %v2991_v30  ;;  %v3014_v28 = vld [vmem:[%s5465_s3 + $0x208] sm:$0xff] }
 0x18f   : > { %3951 = vmatprep.subr.mxu0 %v3010_v31  ;;  %3907 = vmatmul.mubr.f32.gmra.mxu0 %v5004_v32  ;;  %v5096_v0 = vld [vmem:[#allocation2 + $0x32] sm:$0xff] }
 0x190   : > { %3952 = vmatpush3.msra.mxu0 %v3010_v31  ;;  %3979 = vmatprep.mubr.f32.mxu0 %v1403_v27  ;;  %v3031_v27 = vld [vmem:[%s5465_s3 + $0x290] sm:$0xff]  ;;  %v3013_v31 = vld [vmem:[%s5465_s3 + $0x200] sm:$0xff] }
 0x191   : > { %3953 = vmatprep.subr.mxu0 %v3009_v33  ;;  %3920 = vmatpush3.msra.mxu1 %v2991_v30  ;;  %v3030_v30 = vld [vmem:[%s5465_s3 + $0x288] sm:$0xff] }
 0x192   : > { %3954 = vmatpush3.msra.mxu0 %v3009_v33  ;;  %3921 = vmatprep.subr.mxu1 %v2990_v9  ;;  %v3029_v33 = vld [vmem:[%s5465_s3 + $0x280] sm:$0xff] }
 0x193   : > { %3955 = vmatprep.subr.mxu0 %v3008_v35  ;;  %3922 = vmatpush3.msra.mxu1 %v2990_v9  ;;  %v3060_v9 = vld [vmem:[%s5465_s3 + $0x378] sm:$0xff] }
 0x194   : > { %3956 = vmatpush3.msra.mxu0 %v3008_v35  ;;  %3923 = vmatprep.subr.mxu1 %v2989_v36  ;;  %v3076_v35 = vld [vmem:[%s5465_s3 + $0x3f8] sm:$0xff] }
 0x195   : > { %3957 = vmatprep.subr.mxu0 %v3007_v37  ;;  %3924 = vmatpush3.msra.mxu1 %v2989_v36  ;;  %v3059_v36 = vld [vmem:[%s5465_s3 + $0x370] sm:$0xff] }
 0x196   : > { %3958 = vmatpush3.msra.mxu0 %v3007_v37  ;;  %3925 = vmatprep.subr.mxu1 %v2988_v38  ;;  %v3075_v37 = vld [vmem:[%s5465_s3 + $0x3f0] sm:$0xff] }
 0x197   : > { %3959 = vmatprep.subr.mxu0 %v3006_v14  ;;  %3926 = vmatpush3.msra.mxu1 %v2988_v38  ;;  %v3058_v38 = vld [vmem:[%s5465_s3 + $0x368] sm:$0xff] }
 0x198   : > { %3960 = vmatpush3.msra.mxu0 %v3006_v14  ;;  %3927 = vmatprep.subr.mxu1 %v2987_v39  ;;  %v3074_v14 = vld [vmem:[%s5465_s3 + $0x3e8] sm:$0xff] }
 0x199   : > { %3961 = vmatprep.subr.mxu0 %v3005_v40  ;;  %3928 = vmatpush3.msra.mxu1 %v2987_v39  ;;  %v5207_v39 = vld [vmem:[#allocation2 + $0x42] sm:$0xff] }
 0x19a   : > { %3962 = vmatpush3.msra.mxu0 %v3005_v40  ;;  %3929 = vmatprep.subr.mxu1 %v2986_v41  ;;  %v3057_v40 = vld [vmem:[%s5465_s3 + $0x360] sm:$0xff] }
 0x19b   : > { %3963 = vmatprep.subr.mxu0 %v3004_v42  ;;  %3930 = vmatpush3.msra.mxu1 %v2986_v41  ;;  %v3073_v41 = vld [vmem:[%s5465_s3 + $0x3e0] sm:$0xff] }
 0x19c   : > { %3964 = vmatpush3.msra.mxu0 %v3004_v42  ;;  %3931 = vmatprep.subr.mxu1 %v2985_v43  ;;  %v3056_v42 = vld [vmem:[%s5465_s3 + $0x358] sm:$0xff] }
 0x19d   : > { %3965 = vmatprep.subr.mxu0 %v3003_v44  ;;  %3932 = vmatpush3.msra.mxu1 %v2985_v43  ;;  %v3072_v43 = vld [vmem:[%s5465_s3 + $0x3d8] sm:$0xff] }
 0x19e   : > { %3966 = vmatpush3.msra.mxu0 %v3003_v44  ;;  %3933 = vmatprep.subr.mxu1 %v2984_v45  ;;  %v3055_v44 = vld [vmem:[%s5465_s3 + $0x350] sm:$0xff] }
 0x19f   : > { %3967 = vmatprep.subr.mxu0 %v3002_v46  ;;  %3934 = vmatpush3.msra.mxu1 %v2984_v45  ;;  %v3070_v45 = vld [vmem:[%s5465_s3 + $0x3c8] sm:$0xff] }
 0x1a0   : > { %3968 = vmatpush3.msra.mxu0 %v3002_v46  ;;  %3935 = vmatprep.subr.mxu1 %v2983_v47  ;;  %v3053_v46 = vld [vmem:[%s5465_s3 + $0x340] sm:$0xff] }
 0x1a1   : > { %3969 = vmatprep.subr.mxu0 %v3001_v48  ;;  %3936 = vmatpush3.msra.mxu1 %v2983_v47  ;;  %v3069_v47 = vld [vmem:[%s5465_s3 + $0x3c0] sm:$0xff] }
 0x1a2   : > { %3970 = vmatpush3.msra.mxu0 %v3001_v48  ;;  %3937 = vmatprep.subr.mxu1 %v2982_v34  ;;  %v3052_v48 = vld [vmem:[%s5465_s3 + $0x338] sm:$0xff] }
 0x1a3   : > { %3971 = vmatprep.subr.mxu0 %v3000_v49  ;;  %3938 = vmatpush3.msra.mxu1 %v2982_v34  ;;  %v3068_v34 = vld [vmem:[%s5465_s3 + $0x3b8] sm:$0xff] }
 0x1a4   : > { %3972 = vmatpush3.msra.mxu0 %v3000_v49  ;;  %3939 = vmatprep.subr.mxu1 %v2981_v50  ;;  %v3051_v49 = vld [vmem:[%s5465_s3 + $0x330] sm:$0xff] }
 0x1a5   : > { %3973 = vmatprep.subr.mxu0 %v2999_v51  ;;  %3940 = vmatpush3.msra.mxu1 %v2981_v50  ;;  %v3067_v50 = vld [vmem:[%s5465_s3 + $0x3b0] sm:$0xff] }
 0x1a6   : > { %3974 = vmatpush3.msra.mxu0 %v2999_v51  ;;  %3942 = vmatmul.mubr.f32.vlgmr.msra.gmra.mxu1 %v1614_v54  ;;  %v3050_v51 = vld [vmem:[%s5465_s3 + $0x328] sm:$0xff] }
 0x1a7   : > { %3975 = vmatprep.subr.mxu0 %v2998_v52  ;;  %3985 = vmatprep.subr.mxu1 %v3028_v53 }
 0x1a8   : > { %3976 = vmatpush3.msra.mxu0 %v2998_v52  ;;  %3944 = vmatprep.mubr.f32.mxu1 %v5079_v57  ;;  %v3066_v52 = vld [vmem:[%s5465_s3 + $0x3a8] sm:$0xff] }
 0x1a9   : > { %3977 = vmatprep.subr.mxu0 %v2997_v55  ;;  %3986 = vmatpush3.msra.mxu1 %v3028_v53  ;;  %v3049_v53 = vld [vmem:[%s5465_s3 + $0x320] sm:$0xff] }
 0x1aa   : > { %3978 = vmatpush3.msra.mxu0 %v2997_v55  ;;  %3987 = vmatprep.subr.mxu1 %v3027_v58  ;;  %v3048_v55 = vld [vmem:[%s5465_s3 + $0x318] sm:$0xff] }
 0x1ab   : > { %3980 = vmatmul.mubr.f32.vlgmr.msra.gmra.mxu0 %v4994_v29  ;;  %4023 = vmatprep.subr.mxu0 %v3044_v59 }
 0x1ac   : > { %3982 = vmatprep.mubr.f32.mxu0 %v5004_v32  ;;  %4024 = vmatpush3.msra.mxu0 %v3044_v59  ;;  %v3047_v59 = vld [vmem:[%s5465_s3 + $0x310] sm:$0xff] }
 0x1ad   : > { %4025 = vmatprep.subr.mxu0 %v3043_v60  ;;  %3988 = vmatpush3.msra.mxu1 %v3027_v58  ;;  %v3064_v58 = vld [vmem:[%s5465_s3 + $0x398] sm:$0xff] }
 0x1ae   : > { %4026 = vmatpush3.msra.mxu0 %v3043_v60  ;;  %3945 = vmatmul.mubr.f32.gmra.mxu1 %v5096_v0  ;;  %v3063_v60 = vld [vmem:[%s5465_s3 + $0x390] sm:$0xff] }
 0x1af   : > { %3983 = vmatmul.mubr.f32.gmra.mxu0 %v5102_v4  ;;  %3989 = vmatprep.subr.mxu1 %v3026_v63 }
 0x1b0   : > { %4027 = vmatprep.subr.mxu0 %v3042_v3  ;;  %3990 = vmatpush3.msra.mxu1 %v3026_v63  ;;  %v3046_v63 = vld [vmem:[%s5465_s3 + $0x308] sm:$0xff] }
 0x1b1   : > { %4017 = vmatprep.mubr.f32.mxu1 %v4966_v23  ;;  %4028 = vmatpush3.msra.mxu0 %v3042_v3  ;;  %v3019_v23 = vld [vmem:[%s5465_s3 + $0x230] sm:$0xff]  ;;  %v3062_v3 = vld [vmem:[%s5465_s3 + $0x388] sm:$0xff] }
 0x1b2   : > { %4055 = vmatprep.mubr.f32.mxu0 %v1614_v54  ;;  %3991 = vmatprep.subr.mxu1 %v3025_v6  ;;  %v3065_v54 = vld [vmem:[%s5465_s3 + $0x3a0] sm:$0xff] }
 0x1b3   : > { %4029 = vmatprep.subr.mxu0 %v3041_v7  ;;  %3992 = vmatpush3.msra.mxu1 %v3025_v6  ;;  %v3045_v6 = vld [vmem:[%s5465_s3 + $0x300] sm:$0xff] }
 0x1b4   : > { %4030 = vmatpush3.msra.mxu0 %v3041_v7  ;;  %3993 = vmatprep.subr.mxu1 %v3024_v8  ;;  %v3061_v7 = vld [vmem:[%s5465_s3 + $0x380] sm:$0xff] }
 0x1b5   : > { %4031 = vmatprep.subr.mxu0 %v3040_v10  ;;  %3994 = vmatpush3.msra.mxu1 %v3024_v8  ;;  %v3092_v8 = vld [vmem:[%s5465_s3 + $0x478] sm:$0xff] }
 0x1b6   : > { %4032 = vmatpush3.msra.mxu0 %v3040_v10  ;;  %3995 = vmatprep.subr.mxu1 %v3023_v11  ;;  %v3091_v10 = vld [vmem:[%s5465_s3 + $0x470] sm:$0xff] }
 0x1b7   : > { %4033 = vmatprep.subr.mxu0 %v3039_v12  ;;  %3996 = vmatpush3.msra.mxu1 %v3023_v11  ;;  %v3090_v11 = vld [vmem:[%s5465_s3 + $0x468] sm:$0xff] }
 0x1b8   : > { %4034 = vmatpush3.msra.mxu0 %v3039_v12  ;;  %3997 = vmatprep.subr.mxu1 %v3022_v15  ;;  %v2167_v12 = vld [vmem:[#allocation2 + $0x51] sm:$0xff] }
 0x1b9   : > { %4035 = vmatprep.subr.mxu0 %v3038_v16  ;;  %3998 = vmatpush3.msra.mxu1 %v3022_v15  ;;  %v3084_v15 = vld [vmem:[%s5465_s3 + $0x438] sm:$0xff] }
 0x1ba   : > { %4036 = vmatpush3.msra.mxu0 %v3038_v16  ;;  %3999 = vmatprep.subr.mxu1 %v3021_v17  ;;  %v3083_v16 = vld [vmem:[%s5465_s3 + $0x430] sm:$0xff] }
 0x1bb   : > { %4037 = vmatprep.subr.mxu0 %v3037_v20  ;;  %4000 = vmatpush3.msra.mxu1 %v3021_v17  ;;  %v3082_v17 = vld [vmem:[%s5465_s3 + $0x428] sm:$0xff] }
 0x1bc   : > { %4038 = vmatpush3.msra.mxu0 %v3037_v20  ;;  %4001 = vmatprep.subr.mxu1 %v3020_v21  ;;  %v3081_v20 = vld [vmem:[%s5465_s3 + $0x420] sm:$0xff] }
 0x1bd   : > { %4039 = vmatprep.subr.mxu0 %v3036_v22  ;;  %4002 = vmatpush3.msra.mxu1 %v3020_v21  ;;  %v3080_v21 = vld [vmem:[%s5465_s3 + $0x418] sm:$0xff] }
 0x1be   : > { %4040 = vmatpush3.msra.mxu0 %v3036_v22  ;;  %4003 = vmatprep.subr.mxu1 %v3019_v23  ;;  %v3079_v22 = vld [vmem:[%s5465_s3 + $0x410] sm:$0xff] }
 0x1bf   : > { %4041 = vmatprep.subr.mxu0 %v3035_v24  ;;  %4004 = vmatpush3.msra.mxu1 %v3019_v23  ;;  %v3078_v23 = vld [vmem:[%s5465_s3 + $0x408] sm:$0xff] }
 0x1c0   : > { %4042 = vmatpush3.msra.mxu0 %v3035_v24  ;;  %4005 = vmatprep.subr.mxu1 %v3018_v62  ;;  %v3077_v24 = vld [vmem:[%s5465_s3 + $0x400] sm:$0xff] }
 0x1c1   : > { %4043 = vmatprep.subr.mxu0 %v3034_v2  ;;  %4006 = vmatpush3.msra.mxu1 %v3018_v62  ;;  %v2277_v62 = vld [vmem:[#allocation2 + $0x52] sm:$0xff] }
 0x1c2   : > { %4044 = vmatpush3.msra.mxu0 %v3034_v2  ;;  %4007 = vmatprep.subr.mxu1 %v3017_v61  ;;  %v2419_v2 = vld [vmem:[%s5471_s9 + $0x78] sm:$0xff] }
 0x1c3   : > { %4045 = vmatprep.subr.mxu0 %v3033_v1  ;;  %4008 = vmatpush3.msra.mxu1 %v3017_v61  ;;  %v2418_v61 = vld [vmem:[%s5471_s9 + $0x70] sm:$0xff] }
 0x1c4   : > { %4046 = vmatpush3.msra.mxu0 %v3033_v1  ;;  %4009 = vmatprep.subr.mxu1 %v3016_v26  ;;  %v5354_v1 = vld [vmem:[#allocation2] sm:$0xff] }
 0x1c5   : > { %4047 = vmatprep.subr.mxu0 %v3032_v13  ;;  %4010 = vmatpush3.msra.mxu1 %v3016_v26  ;;  %v2415_v26 = vld [vmem:[%s5471_s9 + $0x58] sm:$0xff] }
 0x1c6   : > { %4048 = vmatpush3.msra.mxu0 %v3032_v13  ;;  %4011 = vmatprep.subr.mxu1 %v3015_v5  ;;  %v2414_v13 = vld [vmem:[%s5471_s9 + $0x50] sm:$0xff] }
 0x1c7   : > { %4049 = vmatprep.subr.mxu0 %v3031_v27  ;;  %4012 = vmatpush3.msra.mxu1 %v3015_v5  ;;  %v2413_v5 = vld [vmem:[%s5471_s9 + $0x48] sm:$0xff] }
 0x1c8   : > { %4050 = vmatpush3.msra.mxu0 %v3031_v27  ;;  %4013 = vmatprep.subr.mxu1 %v3014_v28  ;;  %v2412_v27 = vld [vmem:[%s5471_s9 + $0x40] sm:$0xff] }
 0x1c9   : > { %4051 = vmatprep.subr.mxu0 %v3030_v30  ;;  %4014 = vmatpush3.msra.mxu1 %v3014_v28  ;;  %v2411_v28 = vld [vmem:[%s5471_s9 + $0x38] sm:$0xff] }
 0x1ca   : > { %4052 = vmatpush3.msra.mxu0 %v3030_v30  ;;  %4015 = vmatprep.subr.mxu1 %v3013_v31  ;;  %v2410_v30 = vld [vmem:[%s5471_s9 + $0x30] sm:$0xff] }
 0x1cb   : > { %4053 = vmatprep.subr.mxu0 %v3029_v33  ;;  %4016 = vmatpush3.msra.mxu1 %v3013_v31  ;;  %v2409_v31 = vld [vmem:[%s5471_s9 + $0x28] sm:$0xff] }
 0x1cc   : > { %4054 = vmatpush3.msra.mxu0 %v3029_v33  ;;  %4018 = vmatmul.mubr.f32.vlgmr.msra.gmra.mxu1 %v4963_v19  ;;  %v2408_v33 = vld [vmem:[%s5471_s9 + $0x20] sm:$0xff] }
 0x1cd   : > { %4056 = vmatmul.mubr.f32.vlgmr.msra.gmra.mxu0 %v5079_v57  ;;  %4061 = vmatprep.subr.mxu1 %v3060_v9 }
 0x1ce   : > { %4099 = vmatprep.subr.mxu0 %v3076_v35  ;;  %4020 = vmatprep.mubr.f32.mxu1 %v4981_v18 }
 0x1cf   : > { %4058 = vmatprep.mubr.f32.mxu0 %v5096_v0  ;;  %4062 = vmatpush3.msra.mxu1 %v3060_v9  ;;  %v2407_v9 = vld [vmem:[%s5471_s9 + $0x18] sm:$0xff] }
 0x1d0   : > { %4100 = vmatpush3.msra.mxu0 %v3076_v35  ;;  %4063 = vmatprep.subr.mxu1 %v3059_v36  ;;  %v2406_v35 = vld [vmem:[%s5471_s9 + $0x10] sm:$0xff] }
 0x1d1   : > { %4101 = vmatprep.subr.mxu0 %v3075_v37  ;;  %4064 = vmatpush3.msra.mxu1 %v3059_v36  ;;  %v2405_v36 = vld [vmem:[%s5471_s9 + $0x8] sm:$0xff] }
 0x1d2   : > { %4102 = vmatpush3.msra.mxu0 %v3075_v37  ;;  %4021 = vmatmul.mubr.f32.gmra.mxu1 %v4972_v25  ;;  %v2404_v37 = vld [vmem:[%s5471_s9] sm:$0xff] }
 0x1d3   : > { %4059 = vmatmul.mubr.f32.gmra.mxu0 %v5207_v39  ;;  %4065 = vmatprep.subr.mxu1 %v3058_v38 }
 0x1d4   : > { %4103 = vmatprep.subr.mxu0 %v3074_v14  ;;  %4066 = vmatpush3.msra.mxu1 %v3058_v38  ;;  %v2491_v38 = vld [vmem:[%s5467_s5 + $0x8] sm:$0xff] }
 0x1d5   : > { %4093 = vmatprep.mubr.f32.mxu1 %v4994_v29  ;;  %4104 = vmatpush3.msra.mxu0 %v3074_v14  ;;  %v3071_v29 = vld [vmem:[%s5465_s3 + $0x3d0] sm:$0xff]  ;;  %v2490_v14 = vld [vmem:[%s5467_s5] sm:$0xff] }
 0x1d6   : > { %4131 = vmatprep.mubr.f32.mxu0 %v4963_v19  ;;  %4067 = vmatprep.subr.mxu1 %v3057_v40  ;;  %v3054_v19 = vld [vmem:[%s5465_s3 + $0x348] sm:$0xff] }
 0x1d7   : > { %4105 = vmatprep.subr.mxu0 %v3073_v41  ;;  %4068 = vmatpush3.msra.mxu1 %v3057_v40 }
 0x1d8   : > { %4106 = vmatpush3.msra.mxu0 %v3073_v41  ;;  %4069 = vmatprep.subr.mxu1 %v3056_v42 }
 0x1d9   : > { %4107 = vmatprep.subr.mxu0 %v3072_v43  ;;  %4070 = vmatpush3.msra.mxu1 %v3056_v42 }
 0x1da   : > { %4108 = vmatpush3.msra.mxu0 %v3072_v43  ;;  %4071 = vmatprep.subr.mxu1 %v3055_v44 }
 0x1db   : > { %4109 = vmatprep.subr.mxu0 %v3071_v29  ;;  %4072 = vmatpush3.msra.mxu1 %v3055_v44 }
 0x1dc   : > { %4110 = vmatpush3.msra.mxu0 %v3071_v29  ;;  %4073 = vmatprep.subr.mxu1 %v3054_v19 }
 0x1dd   : > { %4111 = vmatprep.subr.mxu0 %v3070_v45  ;;  %4074 = vmatpush3.msra.mxu1 %v3054_v19 }
 0x1de   : > { %4112 = vmatpush3.msra.mxu0 %v3070_v45  ;;  %4075 = vmatprep.subr.mxu1 %v3053_v46 }
 0x1df   : > { %4113 = vmatprep.subr.mxu0 %v3069_v47  ;;  %4076 = vmatpush3.msra.mxu1 %v3053_v46 }
 0x1e0   : > { %4114 = vmatpush3.msra.mxu0 %v3069_v47  ;;  %4077 = vmatprep.subr.mxu1 %v3052_v48 }
 0x1e1   : > { %4115 = vmatprep.subr.mxu0 %v3068_v34  ;;  %4078 = vmatpush3.msra.mxu1 %v3052_v48 }
 0x1e2   : > { %4116 = vmatpush3.msra.mxu0 %v3068_v34  ;;  %4079 = vmatprep.subr.mxu1 %v3051_v49 }
 0x1e3   : > { %4117 = vmatprep.subr.mxu0 %v3067_v50  ;;  %4080 = vmatpush3.msra.mxu1 %v3051_v49 }
 0x1e4   : > { %4118 = vmatpush3.msra.mxu0 %v3067_v50  ;;  %4081 = vmatprep.subr.mxu1 %v3050_v51 }
 0x1e5   : > { %4119 = vmatprep.subr.mxu0 %v3066_v52  ;;  %4082 = vmatpush3.msra.mxu1 %v3050_v51 }
 0x1e6   : > { %4120 = vmatpush3.msra.mxu0 %v3066_v52  ;;  %4083 = vmatprep.subr.mxu1 %v3049_v53 }
 0x1e7   : > { %4121 = vmatprep.subr.mxu0 %v3065_v54  ;;  %4084 = vmatpush3.msra.mxu1 %v3049_v53 }
 0x1e8   : > { %4122 = vmatpush3.msra.mxu0 %v3065_v54  ;;  %4085 = vmatprep.subr.mxu1 %v3048_v55 }
 0x1e9   : > { %4123 = vmatprep.subr.mxu0 %v3064_v58  ;;  %4086 = vmatpush3.msra.mxu1 %v3048_v55 }
 0x1ea   : > { %4124 = vmatpush3.msra.mxu0 %v3064_v58  ;;  %4087 = vmatprep.subr.mxu1 %v3047_v59 }
 0x1eb   : > { %4125 = vmatprep.subr.mxu0 %v3063_v60  ;;  %4088 = vmatpush3.msra.mxu1 %v3047_v59 }
 0x1ec   : > { %4126 = vmatpush3.msra.mxu0 %v3063_v60  ;;  %4089 = vmatprep.subr.mxu1 %v3046_v63 }
 0x1ed   : > { %4127 = vmatprep.subr.mxu0 %v3062_v3  ;;  %4090 = vmatpush3.msra.mxu1 %v3046_v63 }
 0x1ee   : > { %4128 = vmatpush3.msra.mxu0 %v3062_v3  ;;  %4091 = vmatprep.subr.mxu1 %v3045_v6 }
 0x1ef   : > { %4129 = vmatprep.subr.mxu0 %v3061_v7  ;;  %4092 = vmatpush3.msra.mxu1 %v3045_v6 }
 0x1f0   : > { %4130 = vmatpush3.msra.mxu0 %v3061_v7  ;;  %4094 = vmatmul.mubr.f32.vlgmr.msra.gmra.mxu1 %v5004_v32  ;;  %v3087_v32 = vld [vmem:[%s5465_s3 + $0x450] sm:$0xff] }
 0x1f1   : > { %4132 = vmatmul.mubr.f32.vlgmr.msra.gmra.mxu0 %v4981_v18  ;;  %4137 = vmatprep.subr.mxu1 %v3092_v8  ;;  %v3089_v18 = vld [vmem:[%s5465_s3 + $0x460] sm:$0xff] }
 0x1f2   : > { %4096 = vmatprep.mubr.f32.mxu1 %v5102_v4  ;;  %4134 = vmatprep.mubr.f32.mxu0 %v4972_v25  ;;  %v3088_v25 = vld [vmem:[%s5465_s3 + $0x458] sm:$0xff]  ;;  %v3085_v4 = vld [vmem:[%s5465_s3 + $0x440] sm:$0xff] }
 0x1f3   : > { %4138 = vmatpush3.msra.mxu1 %v3092_v8  ;;  %4175 = vmatprep.subr.mxu0 %v4253_v56 }
 0x1f4   : > { %4139 = vmatprep.subr.mxu1 %v3091_v10  ;;  %4097 = vmatmul.mubr.f32.gmra.mxu1 %v4253_v56 }
 0x1f5   : > { %4140 = vmatpush3.msra.mxu1 %v3091_v10  ;;  %4169 = vmatprep.mubr.f32.mxu1 %v5079_v57  ;;  %v3086_v57 = vld [vmem:[%s5465_s3 + $0x448] sm:$0xff] }
 0x1f6   : > { %4141 = vmatprep.subr.mxu1 %v3090_v11  ;;  %4135 = vmatmul.mubr.f32.gmra.mxu0 %v2167_v12 }
 0x1f7   : > { %4142 = vmatpush3.msra.mxu1 %v3090_v11  ;;  %4176 = vmatpush3.msra.mxu0 %v2419_v2 }
 0x1f8   : > { %4143 = vmatprep.subr.mxu1 %v3089_v18  ;;  %4177 = vmatprep.subr.mxu0 %v5354_v1 }
 0x1f9   : > { %4144 = vmatpush3.msra.mxu1 %v3089_v18  ;;  %4178 = vmatpush3.msra.mxu0 %v2418_v61 }
 0x1fa   : > { %4145 = vmatprep.subr.mxu1 %v3088_v25  ;;  %4179 = vmatprep.subr.mxu0 %v5354_v1 }
 0x1fb   : > { %4146 = vmatpush3.msra.mxu1 %v3088_v25  ;;  %4207 = vmatprep.mubr.msk.f32.mxu0 %vm4254_vm0, %v5354_v1 }
 0x1fc   : > { %4147 = vmatprep.subr.mxu1 %v3087_v32 }
 0x1fd   : > { %4148 = vmatpush3.msra.mxu1 %v3087_v32 }
 0x1fe   : > { %4149 = vmatprep.subr.mxu1 %v3086_v57 }
 0x1ff   : > { %4150 = vmatpush3.msra.mxu1 %v3086_v57 }
 0x200   : > { %4151 = vmatprep.subr.mxu1 %v3085_v4 }
 0x201   : > { %4152 = vmatpush3.msra.mxu1 %v3085_v4 }
 0x202   : > { %4153 = vmatprep.subr.mxu1 %v3084_v15 }
 0x203   : > { %4154 = vmatpush3.msra.mxu1 %v3084_v15 }
 0x204   : > { %4155 = vmatprep.subr.mxu1 %v3083_v16 }
 0x205   : > { %4156 = vmatpush3.msra.mxu1 %v3083_v16 }
 0x206   : > { %4157 = vmatprep.subr.mxu1 %v3082_v17 }
 0x207   : > { %4158 = vmatpush3.msra.mxu1 %v3082_v17 }
 0x208   : > { %4159 = vmatprep.subr.mxu1 %v3081_v20 }
 0x209   : > { %4160 = vmatpush3.msra.mxu1 %v3081_v20 }
 0x20a   : > { %4161 = vmatprep.subr.mxu1 %v3080_v21 }
 0x20b   : > { %4162 = vmatpush3.msra.mxu1 %v3080_v21 }
 0x20c   : > { %4163 = vmatprep.subr.mxu1 %v3079_v22 }
 0x20d   : > { %4164 = vmatpush3.msra.mxu1 %v3079_v22 }
 0x20e   : > { %4165 = vmatprep.subr.mxu1 %v3078_v23 }
 0x20f   : > { %4166 = vmatpush3.msra.mxu1 %v3078_v23 }
 0x210   : > { %4167 = vmatprep.subr.mxu1 %v3077_v24 }
 0x211   : > { %4168 = vmatpush3.msra.mxu1 %v3077_v24 }
 0x212   : > { %4170 = vmatmul.mubr.f32.vlgmr.msra.gmra.mxu1 %v5096_v0  ;;  %4210 = vmatprep.subr.mxu1 %v4253_v56  ;;  %v2417_v56 = vld [vmem:[%s5471_s9 + $0x68] sm:$0xff]  ;;  %v2416_v0 = vld [vmem:[%s5471_s9 + $0x60] sm:$0xff] }
 0x213   : > { %4172 = vmatprep.mubr.f32.mxu1 %v5207_v39  ;;  %4180 = vmatpush3.msra.mxu0 %v2417_v56 }
 0x214   : > { %4181 = vmatprep.subr.mxu0 %v5354_v1  ;;  %4211 = vmatpush3.msra.mxu1 %v2491_v38 }
 0x215   : > { %4182 = vmatpush3.msra.mxu0 %v2416_v0  ;;  %4212 = vmatprep.subr.mxu1 %v5354_v1 }
 0x216   : > { %4173 = vmatmul.mubr.f32.gmra.mxu1 %v2277_v62  ;;  %4183 = vmatprep.subr.mxu0 %v5354_v1 }
 0x217   : > { %4184 = vmatpush3.msra.mxu0 %v2415_v26  ;;  %4214 = vmatprep.mubr.msk.f32.mxu1 %vm4254_vm0, %v5354_v1 }
 0x218   : > { %4185 = vmatprep.subr.mxu0 %v5354_v1  ;;  %4213 = vmatpush3.msra.mxu1 %v2490_v14  ;;  %v3093_v14 = vld [vmem:[%s5466_s4] ss:$0 sm:$0xff] }
 0x219   : > { %4186 = vmatpush3.msra.mxu0 %v2414_v13  ;;  %4217 = vmatprep.subr.mxu1 %v5354_v1 }
 0x21a   : > { %4187 = vmatprep.subr.mxu0 %v5354_v1 }
 0x21b   : > { %4188 = vmatpush3.msra.mxu0 %v2413_v5 }
 0x21c   : > { %4189 = vmatprep.subr.mxu0 %v5354_v1 }
 0x21d   : > { %4190 = vmatpush3.msra.mxu0 %v2412_v27 }
 0x21e   : > { %4191 = vmatprep.subr.mxu0 %v5354_v1 }
 0x21f   : > { %4192 = vmatpush3.msra.mxu0 %v2411_v28 }
 0x220   : > { %4193 = vmatprep.subr.mxu0 %v5354_v1 }
 0x221   : > { %4194 = vmatpush3.msra.mxu0 %v2410_v30 }
 0x222   : > { %4195 = vmatprep.subr.mxu0 %v5354_v1 }
 0x223   : > { %4196 = vmatpush3.msra.mxu0 %v2409_v31 }
 0x224   : > { %4197 = vmatprep.subr.mxu0 %v5354_v1 }
 0x225   : > { %4198 = vmatpush3.msra.mxu0 %v2408_v33 }
 0x226   : > { %4199 = vmatprep.subr.mxu0 %v5354_v1 }
 0x227   : > { %4200 = vmatpush3.msra.mxu0 %v2407_v9 }
 0x228   : > { %4201 = vmatprep.subr.mxu0 %v5354_v1 }
 0x229   : > { %4202 = vmatpush3.msra.mxu0 %v2406_v35 }
 0x22a   : > { %4203 = vmatprep.subr.mxu0 %v5354_v1 }
 0x22b   : > { %4204 = vmatpush3.msra.mxu0 %v2405_v36 }
 0x22c   : > { %4205 = vmatprep.subr.mxu0 %v5354_v1 }
 0x22d   : > { %4206 = vmatpush3.msra.mxu0 %v2404_v37 }
 0x243   : > { %v3867_v39 = vpop.f32.mrf.mxu1 }
 0x245   : > { %v1509_v41 = vpop.f32.mrf.mxu1 }
 0x247   : > { %v3870_v43 = vpop.f32.mrf.mxu1 }
 0x249   : > { %v1519_v29 = vpop.f32.mrf.mxu1 }
 0x24b   : > { %v3905_v40 = vpop.f32.mrf.mxu0 }
 0x24c   : > { %v1600_v6 = vadd.f32 %v3905_v40, %v3867_v39 }
 0x24d   : > { %v1594_v42 = vpop.f32.mrf.mxu0 }
 0x24e   : > { %v1595_v7 = vadd.f32 %v1594_v42, %v1509_v41 }
 0x24f   : > { %v3908_v44 = vpop.f32.mrf.mxu0 }
 0x250   : > { %v1610_v18 = vadd.f32 %v3908_v44, %v3870_v43 }
 0x251   : > { %v1604_v45 = vpop.f32.mrf.mxu0 }
 0x252   : > { %v1605_v25 = vadd.f32 %v1604_v45, %v1519_v29 }
 0x266   : > { %v3943_v19 = vpop.f32.mrf.mxu1 }
 0x267   : > { %v1720_v11 = vadd.f32 %v3943_v19, %v1600_v6 }
 0x268   : > { %v1700_v47 = vpop.f32.mrf.mxu1 }
 0x269   : > { %v1719_v12 = vadd.f32 %v1700_v47, %v1595_v7 }
 0x26b   : > { %v3981_v46 = vpop.f32.mrf.mxu0 }
 0x26c   : > { %v1830_v32 = vadd.f32 %v3981_v46, %v1720_v11  ;;  %v2569_v11 = vld [vmem:[%s5470_s8] sm:$0x1] }
 0x26d   : > { %v1810_v48 = vpop.f32.mrf.mxu0 }
 0x26e   : > { %v3946_v34 = vpop.f32.mrf.mxu1  ;;  %v1829_v57 = vadd.f32 %v1810_v48, %v1719_v12 }
 0x26f   : > { %v3984_v49 = vpop.f32.mrf.mxu0  ;;  %v1722_v16 = vadd.f32 %v3946_v34, %v1610_v18 }
 0x270   : > { %v1710_v50 = vpop.f32.mrf.mxu1 }
 0x271   : > { %v1820_v52 = vpop.f32.mrf.mxu0  ;;  %v1721_v17 = vadd.f32 %v1710_v50, %v1605_v25  ;;  %v1832_v22 = vadd.f32 %v3984_v49, %v1722_v16 }
 0x273   : > { %v1831_v23 = vadd.f32 %v1820_v52, %v1721_v17 }
 0x28c   : > { %v4019_v51 = vpop.f32.mrf.mxu1 }
 0x28d   : > { %v4057_v53 = vpop.f32.mrf.mxu0  ;;  %v1940_v20 = vadd.f32 %v4019_v51, %v1830_v32 }
 0x28e   : > { %v1920_v54 = vpop.f32.mrf.mxu1 }
 0x28f   : > { %v2030_v55 = vpop.f32.mrf.mxu0  ;;  %v1939_v21 = vadd.f32 %v1920_v54, %v1829_v57  ;;  %v2050_v24 = vadd.f32 %v4057_v53, %v1940_v20 }
 0x291   : > { %v2049_v62 = vadd.f32 %v2030_v55, %v1939_v21  ;;  %v3099_v21 = vld [vmem:[%s4423_s12 + $0x11] sm:$0xff] }
 0x292   : > { %v4022_v58 = vpop.f32.mrf.mxu1 }
 0x293   : > { %v4060_v59 = vpop.f32.mrf.mxu0  ;;  %v1942_v56 = vadd.f32 %v4022_v58, %v1832_v22 }
 0x294   : > { %v1930_v60 = vpop.f32.mrf.mxu1 }
 0x295   : > { %v2040_v3 = vpop.f32.mrf.mxu0  ;;  %v1941_v0 = vadd.f32 %v1930_v60, %v1831_v23  ;;  %v2052_v27 = vadd.f32 %v4060_v59, %v1942_v56  ;;  %v2568_v59 = vld [vmem:[%s5469_s7] sm:$0xf] }
 0x296   : > { %v2492_v60 = vld [vmem:[%s5468_s6] sm:$0x1]  ;;  %v3100_v23 = vld [vmem:[%s4423_s12 + $0x21] sm:$0xff] }
 0x297   : > { %v2051_v28 = vadd.f32 %v2040_v3, %v1941_v0 }
 0x2b0   : > { %v4095_v63 = vpop.f32.mrf.mxu1 }
 0x2b1   : > { %v4133_v8 = vpop.f32.mrf.mxu0  ;;  %v2161_v26 = vadd.f32 %v4095_v63, %v2050_v24  ;;  %v3101_v24 = vld [vmem:[%s4423_s12 + $0x31] sm:$0xff] }
 0x2b2   : > { %v2141_v10 = vpop.f32.mrf.mxu1 }
 0x2b3   : > { %v2251_v4 = vpop.f32.mrf.mxu0  ;;  %v2160_v13 = vadd.f32 %v2141_v10, %v2049_v62  ;;  %v2271_v30 = vadd.f32 %v4133_v8, %v2161_v26  ;;  %v2655_v8 = vld [vmem:[%s5472_s10 + $0x8] sm:$0xff]  ;;  %v2654_v10 = vld [vmem:[%s5472_s10] sm:$0xff] }
 0x2b4   : > { %v4098_v15 = vpop.f32.mrf.mxu1  ;;  %v3102_v62 = vld [vmem:[%s4423_s12 + $0x41] sm:$0xff] }
 0x2b5   : > { %v2270_v31 = vadd.f32 %v2251_v4, %v2160_v13  ;;  %v2163_v35 = vadd.f32 %v4098_v15, %v2052_v27 }
 0x2b6   : > { %v2151_v2 = vpop.f32.mrf.mxu1  ;;  %v4136_v61 = vpop.f32.mrf.mxu0 }
 0x2b7   : > { %v2162_v36 = vadd.f32 %v2151_v2, %v2051_v28  ;;  %v2273_v40 = vadd.f32 %v4136_v61, %v2163_v35 }
 0x2b8   : > { %v2261_v33 = vpop.f32.mrf.mxu0 }
 0x2b9   : > { %v2272_v41 = vadd.f32 %v2261_v33, %v2162_v36 }
 0x2d2   : > { %v4171_v5 = vpop.f32.mrf.mxu1 }
 0x2d3   : > { %v2381_v37 = vadd.f32 %v4171_v5, %v2271_v30 }
 0x2d4   : > { %v2361_v9 = vpop.f32.mrf.mxu1 }
 0x2d5   : > { %v2380_v38 = vadd.f32 %v2361_v9, %v2270_v31  ;;  %v2392_v44 = vadd.f32 %v3093_v14, %v2381_v37 }
 0x2d6   : > { %v4174_v39 = vpop.f32.mrf.mxu1 }
 0x2d7   : > { %v2391_v42 = vadd.f32 %v3093_v14, %v2380_v38  ;;  %v2383_v29 = vadd.f32 %v4174_v39, %v2273_v40 }
 0x2d8   : > { %v2371_v43 = vpop.f32.mrf.mxu1 }
 0x2d9   : > { %v2382_v19 = vadd.f32 %v2371_v43, %v2272_v41  ;;  %v2395_v45 = vadd.f32 %v2392_v44, %v2391_v42  ;;  %v2394_v47 = vadd.f32 %v3093_v14, %v2383_v29 }
 0x2db   : > { %v2393_v46 = vadd.f32 %v3093_v14, %v2382_v19 }
 0x2dd   : > { %v2396_v48 = vadd.f32 %v2395_v45, %v2393_v46 }
 0x2df   : > { %v2397_v34 = vadd.f32 %v2396_v48, %v2394_v47 }
 0x2e1   : > { %v2398_v49 = vrot.slane %v2397_v34, 4 }
 0x2e3   : > { %v2399_v50 = vadd.f32 %v2398_v49, %v2397_v34 }
 0x2e5   : > { %v2400_v51 = vrot.slane %v2399_v50, 2 }
 0x2e7   : > { %v2401_v52 = vadd.f32 %v2400_v51, %v2399_v50 }
 0x2e9   : > { %v2402_v53 = vrot.slane %v2401_v52, 1 }
 0x2eb   : > { %v2403_v54 = vadd.f32 %v2402_v53, %v2401_v52 }
 0x2ed   : > { %4208 = vmatmul.mubr.f32.vlgmr.msra.gmra.mxu0 %v2403_v54 }
 0x3ad   : > { %v2486_v55 = vpop.f32.mrf.mxu0 }
 0x3ae   : > { %4215 = vmatmul.mubr.msk.f32.vlgmr.msra.gmra.mxu1 %vm2493_vm1, %v2486_v55 }
 0x3af   : > { %v4209_v58 = vpop.f32.mrf.mxu0  ;;  %4219 = vmatprep.mubr.msk.f32.mxu1 %vm4254_vm0, %v5354_v1  ;;  %4218 = vmatpush3.msk.msra.mxu1 %vm2574_vm2, %v2568_v59 }
 0x3b0   : > { %4222 = vmatprep.subr.mxu1 %v5354_v1 }
 0x46e   : > { %v2563_v63 = vpop.f32.mrf.mxu1 }
 0x46f   : > { %v2564_v3 = vadd.f32 %v2563_v63, %v2492_v60 }
 0x470   : > { %v4216_v6 = vpop.f32.mrf.mxu1 }
 0x471   : > { %v2567_v7 = vmax.f32 %v2564_v3, 0.0 }
 0x473   : > { %4220 = vmatmul.mubr.msk.f32.vlgmr.msra.gmra.mxu1 %vm2570_vm3, %v2567_v7 }
 0x474   : > { %4226 = vmatprep.mubr.msk.f32.mxu1 %vm4254_vm0, %v5354_v1  ;;  %4223 = vmatpush3.msra.mxu1 %v2655_v8 }
 0x475   : > { %4224 = vmatprep.subr.mxu1 %v5354_v1  ;;  %v2733_v1 = vlaneseq }
 0x476   : > { %4225 = vmatpush3.msra.mxu1 %v2654_v10 }
 0x477   : > { %v2734_v16 = vshrl.u32 %v2733_v1, 7 }
 0x479   : > { %v2735_v17 = vsub.s32 0, %v2734_v16 }
 0x533   : > { %v2644_v12 = vpop.f32.mrf.mxu1 }
 0x534   : > { %v2645_v18 = vadd.f32 %v2644_v12, %v2569_v11 }
 0x535   : > { %v4221_v25 = vpop.f32.mrf.mxu1 }
 0x536   : > { %v3097_v32 = vmul.f32 -1.442695, %v2645_v18 }
 0x538   : > { %4240 = vpow2.f32 %v3097_v32 }
 0x545   : > { %v4241_v57 = vpop.eup %4240 }
 0x546   : > { %v2651_v4 = vadd.f32 1.0, %v4241_v57 }
 0x548   : > { %4242 = vrcp.f32 %v2651_v4 }
 0x555   : > { %v4243_v15 = vpop.eup %4242 }
 0x556   : > { %4227 = vmatmul.mubr.msk.f32.vlgmr.msra.gmra.mxu1 %vm2493_vm1, %v4243_v15 }
 0x616   : > { %v2725_v20 = vpop.f32.mrf.mxu1 }
 0x617   : > { %v2736_v22 = vrot.slane %v2725_v20, %v2735_v17 }
 0x618   : > { %v4228_v2 = vpop.f32.mrf.mxu1 }
 0x619   : > { %v2737_v61 = vmul.f32 %v2736_v22, %v2391_v42  ;;  %v2738_v56 = vmul.f32 %v2736_v22, %v2392_v44  ;;  %v2739_v0 = vmul.f32 %v2736_v22, %v2393_v46  ;;  %v2740_v26 = vmul.f32 %v2736_v22, %v2394_v47 }
 0x61b   : > { %v2741_v13 = vadd.f32 %v3099_v21, %v2737_v61  ;;  %v2742_v5 = vadd.f32 %v3100_v23, %v2738_v56  ;;  %v2743_v27 = vadd.f32 %v3101_v24, %v2739_v0  ;;  %v2744_v28 = vadd.f32 %v3102_v62, %v2740_v26 }
 0x61d   : > { %2745 = vst [vmem:[%s386_s24] sm:$0xff] %v2741_v13  ;;  %2746 = vst [vmem:[%s386_s24 + $0x8] sm:$0xff] %v2742_v5 }
 0x61e   : > { %2747 = vst [vmem:[%s386_s24 + $0x10] sm:$0xff] %v2743_v27  ;;  %2748 = vst [vmem:[%s386_s24 + $0x18] sm:$0xff] %v2744_v28 }
 0x61f PF: > { %s21_s17 = sadd.s32 1, %s4251_s17  }
 0x620   : > { %p18_p4 = scmp.ge.s32.totalorder %s21_s17, 4  }
 0x622   :  { %20 = sbr.rel (!%p18_p4) target bundleno = 1 (0x1), region = 114 }

</bundles_post_ra>
